<compile_context>
chip_gen: v7x
topology: tpu7x:2x2x1
jax: 0.10.0
libtpu: 0.0.40
codegen_flags: <defaults>
</compile_context>

<pallas_src>
import functools

import jax
import jax.numpy as jnp
from jax.experimental import pallas as pl
from jax.experimental.pallas import tpu as pltpu


_SLAB = 128  # lane-dense output width: [0:A) = probs, A = value, rest = 0


# ----------------------------------------------------------------------------
# Kernels
# ----------------------------------------------------------------------------
def _conv_relu_kernel(p_ref, w_ref, b_ref, o_ref):
    """im2col conv: (B*OH*OW, Cin*9) @ (Cin*9, Cout) + bias, then ReLU."""
    acc = jnp.dot(p_ref[...], w_ref[...], preferred_element_type=jnp.float32)
    o_ref[...] = jnp.maximum(acc + b_ref[...], 0.0)


def _head_kernel(f_ref, we_ref, be_ref, wpv_ref, bpv_ref, wh_ref, bh_ref,
                 o_ref, *, num_actions):
    """Fused MLP trunk.

    h    = relu(feats @ w_enc_p + b_enc)
    hpv  = silu(h @ [w_policy | w_value] + [b_policy | b_value])   (one matmul)
    slab = hpv @ w_heads + b_heads                                  (one matmul)
           cols [0:A) -> policy logits, col A -> value, rest 0
    out  = softmax over cols [0:A), value scattered into col A     (lane-dense)
    """
    h = jnp.dot(f_ref[...], we_ref[...], preferred_element_type=jnp.float32)
    h = jnp.maximum(h + be_ref[...], 0.0)

    z = jnp.dot(h, wpv_ref[...], preferred_element_type=jnp.float32) + bpv_ref[...]
    hpv = z * jax.nn.sigmoid(z)  # SiLU on policy and value branch at once

    slab = jnp.dot(hpv, wh_ref[...], preferred_element_type=jnp.float32) + bh_ref[...]

    lane = jax.lax.broadcasted_iota(jnp.int32, slab.shape, 1)
    is_action = lane < num_actions
    logits = jnp.where(is_action, slab, -1e30)           # mask non-action lanes
    m = jnp.max(logits, axis=1, keepdims=True)
    e = jnp.exp(logits - m)                               # 0 in masked lanes
    denom = jnp.sum(e, axis=1, keepdims=True)
    probs = e * pl.reciprocal(denom, approx=True)         # EUP vrcp

    value = slab[:, num_actions:num_actions + 1]          # (B, 1)
    value_mask = (lane == num_actions).astype(jnp.float32)
    o_ref[...] = probs + value * value_mask               # single (B, 128) store


def _full_spec(shape):
    # whole-array block (allowed even when dims aren't (8,128) multiples)
    return pl.BlockSpec(shape, lambda i: (0,) * len(shape))


# ----------------------------------------------------------------------------
# pallas_call wrappers (traced inside the jitted forward)
# ----------------------------------------------------------------------------
def _conv_relu(patches, w_mat, b_row):
    out_shape = jax.ShapeDtypeStruct((patches.shape[0], w_mat.shape[1]), jnp.float32)
    return pl.pallas_call(
        _conv_relu_kernel,
        grid=(1,),
        in_specs=[_full_spec(patches.shape),
                  _full_spec(w_mat.shape),
                  _full_spec(b_row.shape)],
        out_specs=_full_spec(out_shape.shape),
        out_shape=out_shape,
        compiler_params=pltpu.CompilerParams(dimension_semantics=("arbitrary",)),
    )(patches, w_mat, b_row)


def _heads(feats, w_enc_p, b_enc, w_pv, b_pv, w_heads, b_heads, num_actions):
    B = feats.shape[0]
    out_shape = jax.ShapeDtypeStruct((B, w_heads.shape[1]), jnp.float32)
    args = (feats, w_enc_p, b_enc, w_pv, b_pv, w_heads, b_heads)
    return pl.pallas_call(
        functools.partial(_head_kernel, num_actions=num_actions),
        grid=(1,),
        in_specs=[_full_spec(a.shape) for a in args],
        out_specs=_full_spec(out_shape.shape),
        out_shape=out_shape,
        compiler_params=pltpu.CompilerParams(dimension_semantics=("arbitrary",)),
    )(*args)


# ----------------------------------------------------------------------------
# Parameters
# ----------------------------------------------------------------------------
def init_params(key, width, height, num_frames, num_actions,
                num_fc_hidden_units=32, num_channels=8):
    """PyTorch-layout parameters (weights stored as (in, out) already)."""
    ks = jax.random.split(key, 12)
    oh, ow = height - 2, width - 2
    feat_dim = num_channels * oh * ow

    def lin(k, fan_in, fan_out):
        s = 1.0 / jnp.sqrt(jnp.float32(fan_in))
        return jax.random.uniform(k, (fan_in, fan_out), jnp.float32, -s, s)

    return {
        # conv weight stored PyTorch-style (Cout, Cin, 3, 3)
        "w_conv": jax.random.uniform(ks[0], (num_channels, num_frames, 3, 3),
                                     jnp.float32, -0.1, 0.1),
        "b_conv": jax.random.uniform(ks[1], (num_channels,), jnp.float32, -0.1, 0.1),
        "w_enc": lin(ks[2], feat_dim, num_fc_hidden_units),
        "b_enc": jax.random.uniform(ks[3], (num_fc_hidden_units,), jnp.float32, -0.05, 0.05),
        "w_policy": lin(ks[4], num_fc_hidden_units, num_fc_hidden_units),
        "b_policy": jax.random.uniform(ks[5], (num_fc_hidden_units,), jnp.float32, -0.05, 0.05),
        "w_value": lin(ks[6], num_fc_hidden_units, num_fc_hidden_units),
        "b_value": jax.random.uniform(ks[7], (num_fc_hidden_units,), jnp.float32, -0.05, 0.05),
        "w_policy_head": lin(ks[8], num_fc_hidden_units, num_actions),
        "b_policy_head": jax.random.uniform(ks[9], (num_actions,), jnp.float32, -0.05, 0.05),
        "w_value_head": lin(ks[10], num_fc_hidden_units, 1),
        "b_value_head": jax.random.uniform(ks[11], (1,), jnp.float32, -0.05, 0.05),
    }


def prepare_params(params, width, height, num_actions):
    """One-time packing of PyTorch-style params into the kernel layout."""
    oh, ow = height - 2, width - 2
    P = oh * ow
    c_out, c_in = params["w_conv"].shape[:2]
    hid = params["w_enc"].shape[1]
    assert num_actions + 1 <= _SLAB

    # conv weight as matmul RHS, column order (ci, kh, kw) to match im2col
    w_conv_mat = params["w_conv"].reshape(c_out, c_in * 9).T          # (Cin*9, Cout)
    b_conv_row = params["b_conv"].reshape(1, c_out)

    # fold the PyTorch (Cout, OH, OW) flatten order into w_enc so the conv
    # output (rows = (b, oh, ow), cols = cout) feeds it with a plain reshape.
    w_enc_p = (params["w_enc"].reshape(c_out, P, hid)
               .transpose(1, 0, 2).reshape(P * c_out, hid))
    b_enc_row = params["b_enc"].reshape(1, hid)

    # pack fc_policy / fc_value into one matmul
    w_pv = jnp.concatenate([params["w_policy"], params["w_value"]], axis=1)  # (H, 2H)
    b_pv = jnp.concatenate([params["b_policy"], params["b_value"]]).reshape(1, 2 * hid)

    # pack policy_head / value_head into one lane-dense (2H, 128) matmul:
    # rows [0:H) only feed the action columns, rows [H:2H) only feed col A.
    w_heads = jnp.zeros((2 * hid, _SLAB), jnp.float32)
    w_heads = w_heads.at[:hid, :num_actions].set(params["w_policy_head"])
    w_heads = w_heads.at[hid:, num_actions].set(params["w_value_head"][:, 0])
    b_heads = jnp.zeros((1, _SLAB), jnp.float32)
    b_heads = b_heads.at[0, :num_actions].set(params["b_policy_head"])
    b_heads = b_heads.at[0, num_actions].set(params["b_value_head"][0])

    return {"w_conv_mat": w_conv_mat, "b_conv_row": b_conv_row,
            "w_enc_p": w_enc_p, "b_enc_row": b_enc_row,
            "w_pv": w_pv, "b_pv": b_pv,
            "w_heads": w_heads, "b_heads": b_heads}


# ----------------------------------------------------------------------------
# Forward pass (fully jitted: glue + both Pallas kernels in one XLA program)
# ----------------------------------------------------------------------------
@functools.partial(jax.jit, static_argnames=("num_actions",))
def ppo_forward(x, kp, num_actions):
    """x: (B, num_frames, H, W) f32. Returns (probs (B, A), value (B, 1))."""
    B, C, H, W = x.shape
    OH, OW = H - 2, W - 2
    P = OH * OW
    c_out = kp["w_conv_mat"].shape[1]

    # im2col patch extraction; column order (ci, kh, kw) matches w_conv_mat.
    cols = []
    for kh in range(3):
        for kw in range(3):
            cols.append(x[:, :, kh:kh + OH, kw:kw + OW])            # (B, C, OH, OW)
    patches = jnp.stack(cols, axis=2)                               # (B, C, 9, OH, OW)
    patches = patches.transpose(0, 3, 4, 1, 2).reshape(B * P, C * 9)

    # Pallas kernel 1: conv-as-matmul + bias + ReLU
    conv_out = _conv_relu(patches, kp["w_conv_mat"], kp["b_conv_row"])  # (B*P, Cout)

    # row-major reinterpretation; no transpose (folded into w_enc_p)
    feats = conv_out.reshape(B, P * c_out)

    # Pallas kernel 2: encoder FC + packed policy/value branches + packed heads
    slab = _heads(feats, kp["w_enc_p"], kp["b_enc_row"], kp["w_pv"], kp["b_pv"],
                  kp["w_heads"], kp["b_heads"], num_actions)        # (B, 128)

    probs = slab[:, :num_actions]
    value = slab[:, num_actions:num_actions + 1]
    return probs, value


# ----------------------------------------------------------------------------
# Pure-JAX reference (for correctness check)
# ----------------------------------------------------------------------------
def ppo_forward_reference(x, params):
    B = x.shape[0]
    conv = jax.lax.conv_general_dilated(
        x, params["w_conv"], window_strides=(1, 1), padding="VALID",
        dimension_numbers=("NCHW", "OIHW", "NCHW"))
    conv = jnp.maximum(conv + params["b_conv"][None, :, None, None], 0.0)
    feats = conv.reshape(B, -1)
    h = jnp.maximum(feats @ params["w_enc"] + params["b_enc"], 0.0)
    hp = jax.nn.silu(h @ params["w_policy"] + params["b_policy"])
    hv = jax.nn.silu(h @ params["w_value"] + params["b_value"])
    logits = hp @ params["w_policy_head"] + params["b_policy_head"]
    probs = jax.nn.softmax(logits, axis=1)
    value = hv @ params["w_value_head"] + params["b_value_head"]
    return probs, value


if __name__ == "__main__":
    # small shapes: batch=2, num_frames=4, 16x16 frames, 6 actions,
    # hidden=32, conv channels=8
    B, FRAMES, H, W = 2, 4, 16, 16
    NUM_ACTIONS, HIDDEN, CHANNELS = 6, 32, 8

    key = jax.random.PRNGKey(0)
    key_x, key_p = jax.random.split(key)
    x = jax.random.normal(key_x, (B, FRAMES, H, W), jnp.float32)
    params = init_params(key_p, W, H, FRAMES, NUM_ACTIONS,
                         num_fc_hidden_units=HIDDEN, num_channels=CHANNELS)
    kparams = prepare_params(params, W, H, NUM_ACTIONS)

    probs, value = ppo_forward(x, kparams, num_actions=NUM_ACTIONS)
    jax.block_until_ready((probs, value))

    assert probs.shape == (B, NUM_ACTIONS)
    assert value.shape == (B, 1)
    # softmax rows sum to ~1 (approx reciprocal -> loose tolerance)
    assert bool(jnp.all(jnp.abs(jnp.sum(probs, axis=1) - 1.0) < 1e-2))

    # compare against pure-JAX reference
    probs_ref, value_ref = ppo_forward_reference(x, params)
    assert bool(jnp.max(jnp.abs(probs - probs_ref)) < 1e-2)
    assert bool(jnp.max(jnp.abs(value - value_ref)) < 1e-3)

    print("KERNEL_OK")
</pallas_src>

<mosaic_0001>
module attributes {stable_mosaic.version = 11 : i64} {
  func.func @_conv_relu_kernel(%arg0: i32, %arg1: memref<392x36xf32, #tpu.memory_space<vmem>>, %arg2: memref<36x8xf32, #tpu.memory_space<vmem>>, %arg3: memref<1x8xf32, #tpu.memory_space<vmem>>, %arg4: memref<392x8xf32, #tpu.memory_space<vmem>>) attributes {dimension_semantics = [#tpu.dimension_semantics<arbitrary>], iteration_bounds = array<i64: 1>, scalar_prefetch = 0 : i64, scratch_operands = 0 : i64, tpu.core_type = #tpu.core_type<tc>, window_params = [{pipeline_mode = #tpu.pipeline_mode<synchronous>, transform_indices = @transform_0, window_bounds = array<i64: 392, 36>}, {pipeline_mode = #tpu.pipeline_mode<synchronous>, transform_indices = @transform_1, window_bounds = array<i64: 36, 8>}, {pipeline_mode = #tpu.pipeline_mode<synchronous>, transform_indices = @transform_2, window_bounds = array<i64: 1, 8>}, {pipeline_mode = #tpu.pipeline_mode<synchronous>, transform_indices = @transform_3, window_bounds = array<i64: 392, 8>}]} {
    %c0 = arith.constant 0 : index
    %c0_0 = arith.constant 0 : index
    %0 = vector.load %arg1[%c0, %c0_0] : memref<392x36xf32, #tpu.memory_space<vmem>>, vector<392x36xf32>
    %c0_1 = arith.constant 0 : index
    %c0_2 = arith.constant 0 : index
    %1 = vector.load %arg2[%c0_1, %c0_2] : memref<36x8xf32, #tpu.memory_space<vmem>>, vector<36x8xf32>
    %cst = arith.constant dense<0.000000e+00> : vector<392x8xf32>
    %2 = tpu.matmul %0, %1, %cst {dimension_numbers = #tpu.dot_dimension_numbers<[1], [0], [0], [1], [0, 0, 1, 1], [], []>} : vector<392x36xf32>, vector<36x8xf32>, vector<392x8xf32> -> vector<392x8xf32>
    %c0_3 = arith.constant 0 : index
    %c0_4 = arith.constant 0 : index
    %3 = vector.load %arg3[%c0_3, %c0_4] : memref<1x8xf32, #tpu.memory_space<vmem>>, vector<1x8xf32>
    %4 = vector.broadcast %3 : vector<1x8xf32> to vector<392x8xf32>
    %5 = arith.addf %2, %4 : vector<392x8xf32>
    %cst_5 = arith.constant 0.000000e+00 : f32
    %6 = vector.broadcast %cst_5 : f32 to vector<392x8xf32>
    %7 = arith.maximumf %5, %6 : vector<392x8xf32>
    %c0_6 = arith.constant 0 : index
    %c0_7 = arith.constant 0 : index
    %8 = vector.load %arg4[%c0_6, %c0_7] : memref<392x8xf32, #tpu.memory_space<vmem>>, vector<392x8xf32>
    tpu.vector_store %arg4[%c0_6, %c0_7], %7 {strides = array<i32>} : memref<392x8xf32, #tpu.memory_space<vmem>>, vector<392x8xf32>,
    return
  }
  func.func @transform_0(%arg0: i32) -> (i32, i32) {
    %c0_i32 = arith.constant 0 : i32
    %c0_i32_0 = arith.constant 0 : i32
    %c0_i32_1 = arith.constant 0 : i32
    return %c0_i32, %c0_i32_0 : i32, i32
  }
  func.func @transform_1(%arg0: i32) -> (i32, i32) {
    %c0_i32 = arith.constant 0 : i32
    %c0_i32_0 = arith.constant 0 : i32
    %c0_i32_1 = arith.constant 0 : i32
    return %c0_i32, %c0_i32_0 : i32, i32
  }
  func.func @transform_2(%arg0: i32) -> (i32, i32) {
    %c0_i32 = arith.constant 0 : i32
    %c0_i32_0 = arith.constant 0 : i32
    %c0_i32_1 = arith.constant 0 : i32
    return %c0_i32, %c0_i32_0 : i32, i32
  }
  func.func @transform_3(%arg0: i32) -> (i32, i32) {
    %c0_i32 = arith.constant 0 : i32
    %c0_i32_0 = arith.constant 0 : i32
    %c0_i32_1 = arith.constant 0 : i32
    return %c0_i32, %c0_i32_0 : i32, i32
  }
}

module attributes {stable_mosaic.version = 11 : i64} {
  func.func @_head_kernel(%arg0: i32, %arg1: memref<2x1568xf32, #tpu.memory_space<vmem>>, %arg2: memref<1568x32xf32, #tpu.memory_space<vmem>>, %arg3: memref<1x32xf32, #tpu.memory_space<vmem>>, %arg4: memref<32x64xf32, #tpu.memory_space<vmem>>, %arg5: memref<1x64xf32, #tpu.memory_space<vmem>>, %arg6: memref<64x128xf32, #tpu.memory_space<vmem>>, %arg7: memref<1x128xf32, #tpu.memory_space<vmem>>, %arg8: memref<2x128xf32, #tpu.memory_space<vmem>>) attributes {dimension_semantics = [#tpu.dimension_semantics<arbitrary>], iteration_bounds = array<i64: 1>, scalar_prefetch = 0 : i64, scratch_operands = 0 : i64, tpu.core_type = #tpu.core_type<tc>, window_params = [{pipeline_mode = #tpu.pipeline_mode<synchronous>, transform_indices = @transform_0, window_bounds = array<i64: 2, 1568>}, {pipeline_mode = #tpu.pipeline_mode<synchronous>, transform_indices = @transform_1, window_bounds = array<i64: 1568, 32>}, {pipeline_mode = #tpu.pipeline_mode<synchronous>, transform_indices = @transform_2, window_bounds = array<i64: 1, 32>}, {pipeline_mode = #tpu.pipeline_mode<synchronous>, transform_indices = @transform_3, window_bounds = array<i64: 32, 64>}, {pipeline_mode = #tpu.pipeline_mode<synchronous>, transform_indices = @transform_4, window_bounds = array<i64: 1, 64>}, {pipeline_mode = #tpu.pipeline_mode<synchronous>, transform_indices = @transform_5, window_bounds = array<i64: 64, 128>}, {pipeline_mode = #tpu.pipeline_mode<synchronous>, transform_indices = @transform_6, window_bounds = array<i64: 1, 128>}, {pipeline_mode = #tpu.pipeline_mode<synchronous>, transform_indices = @transform_7, window_bounds = array<i64: 2, 128>}]} {
    %c0 = arith.constant 0 : index
    %c0_0 = arith.constant 0 : index
    %0 = vector.load %arg1[%c0, %c0_0] : memref<2x1568xf32, #tpu.memory_space<vmem>>, vector<2x1568xf32>
    %c0_1 = arith.constant 0 : index
    %c0_2 = arith.constant 0 : index
    %1 = vector.load %arg2[%c0_1, %c0_2] : memref<1568x32xf32, #tpu.memory_space<vmem>>, vector<1568x32xf32>
    %cst = arith.constant dense<0.000000e+00> : vector<2x32xf32>
    %2 = tpu.matmul %0, %1, %cst {dimension_numbers = #tpu.dot_dimension_numbers<[1], [0], [0], [1], [0, 0, 1, 1], [], []>} : vector<2x1568xf32>, vector<1568x32xf32>, vector<2x32xf32> -> vector<2x32xf32>
    %c0_3 = arith.constant 0 : index
    %c0_4 = arith.constant 0 : index
    %3 = vector.load %arg3[%c0_3, %c0_4] : memref<1x32xf32, #tpu.memory_space<vmem>>, vector<1x32xf32>
    %4 = vector.broadcast %3 : vector<1x32xf32> to vector<2x32xf32>
    %5 = arith.addf %2, %4 : vector<2x32xf32>
    %cst_5 = arith.constant 0.000000e+00 : f32
    %6 = vector.broadcast %cst_5 : f32 to vector<2x32xf32>
    %7 = arith.maximumf %5, %6 : vector<2x32xf32>
    %c0_6 = arith.constant 0 : index
    %c0_7 = arith.constant 0 : index
    %8 = vector.load %arg4[%c0_6, %c0_7] : memref<32x64xf32, #tpu.memory_space<vmem>>, vector<32x64xf32>
    %cst_8 = arith.constant dense<0.000000e+00> : vector<2x64xf32>
    %9 = tpu.matmul %7, %8, %cst_8 {dimension_numbers = #tpu.dot_dimension_numbers<[1], [0], [0], [1], [0, 0, 1, 1], [], []>} : vector<2x32xf32>, vector<32x64xf32>, vector<2x64xf32> -> vector<2x64xf32>
    %c0_9 = arith.constant 0 : index
    %c0_10 = arith.constant 0 : index
    %10 = vector.load %arg5[%c0_9, %c0_10] : memref<1x64xf32, #tpu.memory_space<vmem>>, vector<1x64xf32>
    %11 = vector.broadcast %10 : vector<1x64xf32> to vector<2x64xf32>
    %12 = arith.addf %9, %11 : vector<2x64xf32>
    %13 = arith.negf %12 : vector<2x64xf32>
    %14 = math.exp %13 : vector<2x64xf32>
    %cst_11 = arith.constant 1.000000e+00 : f32
    %15 = vector.broadcast %cst_11 : f32 to vector<2x64xf32>
    %16 = arith.addf %15, %14 : vector<2x64xf32>
    %17 = arith.divf %15, %16 : vector<2x64xf32>
    %18 = arith.mulf %12, %17 : vector<2x64xf32>
    %c0_12 = arith.constant 0 : index
    %c0_13 = arith.constant 0 : index
    %19 = vector.load %arg6[%c0_12, %c0_13] : memref<64x128xf32, #tpu.memory_space<vmem>>, vector<64x128xf32>
    %cst_14 = arith.constant dense<0.000000e+00> : vector<2x128xf32>
    %20 = tpu.matmul %18, %19, %cst_14 {dimension_numbers = #tpu.dot_dimension_numbers<[1], [0], [0], [1], [0, 0, 1, 1], [], []>} : vector<2x64xf32>, vector<64x128xf32>, vector<2x128xf32> -> vector<2x128xf32>
    %c0_15 = arith.constant 0 : index
    %c0_16 = arith.constant 0 : index
    %21 = vector.load %arg7[%c0_15, %c0_16] : memref<1x128xf32, #tpu.memory_space<vmem>>, vector<1x128xf32>
    %22 = vector.broadcast %21 : vector<1x128xf32> to vector<2x128xf32>
    %23 = arith.addf %20, %22 : vector<2x128xf32>
    %24 = tpu.iota {dimensions = array<i32: 1>} : vector<2x128xi32>
    %c6_i32 = arith.constant 6 : i32
    %25 = vector.broadcast %c6_i32 : i32 to vector<2x128xi32>
    %26 = arith.cmpi slt, %24, %25 : vector<2x128xi32>
    %cst_17 = arith.constant -1.000000e+30 : f32
    %27 = vector.broadcast %cst_17 : f32 to vector<2x128xf32>
    %28 = arith.select %26, %23, %27 : vector<2x128xi1>, vector<2x128xf32>
    %cst_18 = arith.constant dense<0xFF800000> : vector<2xf32>
    %29 = vector.multi_reduction <maximumf>, %28, %cst_18 [1] : vector<2x128xf32> to vector<2xf32>
    %30 = vector.shape_cast %29 : vector<2xf32> to vector<2x1xf32>
    %31 = vector.broadcast %30 : vector<2x1xf32> to vector<2x128xf32>
    %32 = arith.subf %28, %31 : vector<2x128xf32>
    %33 = math.exp %32 : vector<2x128xf32>
    %cst_19 = arith.constant dense<0.000000e+00> : vector<2xf32>
    %34 = vector.multi_reduction <add>, %33, %cst_19 [1] : vector<2x128xf32> to vector<2xf32>
    %35 = vector.shape_cast %34 : vector<2xf32> to vector<2x1xf32>
    %36 = tpu.reciprocal %35 {approx = true} : vector<2x1xf32> -> vector<2x1xf32>
    %37 = vector.broadcast %36 : vector<2x1xf32> to vector<2x128xf32>
    %38 = arith.mulf %33, %37 : vector<2x128xf32>
    %39 = vector.extract_strided_slice %23 {offsets = [0, 6], sizes = [2, 1], strides = [1, 1]} : vector<2x128xf32> to vector<2x1xf32>
    %c6_i32_20 = arith.constant 6 : i32
    %40 = vector.broadcast %c6_i32_20 : i32 to vector<2x128xi32>
    %41 = arith.cmpi eq, %24, %40 : vector<2x128xi32>
    %42 = arith.extui %41 : vector<2x128xi1> to vector<2x128xi32>
    %43 = arith.sitofp %42 : vector<2x128xi32> to vector<2x128xf32>
    %44 = vector.broadcast %39 : vector<2x1xf32> to vector<2x128xf32>
    %45 = arith.mulf %44, %43 : vector<2x128xf32>
    %46 = arith.addf %38, %45 : vector<2x128xf32>
    %c0_21 = arith.constant 0 : index
    %c0_22 = arith.constant 0 : index
    %47 = vector.load %arg8[%c0_21, %c0_22] : memref<2x128xf32, #tpu.memory_space<vmem>>, vector<2x128xf32>
    tpu.vector_store %arg8[%c0_21, %c0_22], %46 {strides = array<i32>} : memref<2x128xf32, #tpu.memory_space<vmem>>, vector<2x128xf32>,
    return
  }
  func.func @transform_0(%arg0: i32) -> (i32, i32) {
    %c0_i32 = arith.constant 0 : i32
    %c0_i32_0 = arith.constant 0 : i32
    %c0_i32_1 = arith.constant 0 : i32
    return %c0_i32, %c0_i32_0 : i32, i32
  }
  func.func @transform_1(%arg0: i32) -> (i32, i32) {
    %c0_i32 = arith.constant 0 : i32
    %c0_i32_0 = arith.constant 0 : i32
    %c0_i32_1 = arith.constant 0 : i32
    return %c0_i32, %c0_i32_0 : i32, i32
  }
  func.func @transform_2(%arg0: i32) -> (i32, i32) {
    %c0_i32 = arith.constant 0 : i32
    %c0_i32_0 = arith.constant 0 : i32
    %c0_i32_1 = arith.constant 0 : i32
    return %c0_i32, %c0_i32_0 : i32, i32
  }
  func.func @transform_3(%arg0: i32) -> (i32, i32) {
    %c0_i32 = arith.constant 0 : i32
    %c0_i32_0 = arith.constant 0 : i32
    %c0_i32_1 = arith.constant 0 : i32
    return %c0_i32, %c0_i32_0 : i32, i32
  }
  func.func @transform_4(%arg0: i32) -> (i32, i32) {
    %c0_i32 = arith.constant 0 : i32
    %c0_i32_0 = arith.constant 0 : i32
    %c0_i32_1 = arith.constant 0 : i32
    return %c0_i32, %c0_i32_0 : i32, i32
  }
  func.func @transform_5(%arg0: i32) -> (i32, i32) {
    %c0_i32 = arith.constant 0 : i32
    %c0_i32_0 = arith.constant 0 : i32
    %c0_i32_1 = arith.constant 0 : i32
    return %c0_i32, %c0_i32_0 : i32, i32
  }
  func.func @transform_6(%arg0: i32) -> (i32, i32) {
    %c0_i32 = arith.constant 0 : i32
    %c0_i32_0 = arith.constant 0 : i32
    %c0_i32_1 = arith.constant 0 : i32
    return %c0_i32, %c0_i32_0 : i32, i32
  }
  func.func @transform_7(%arg0: i32) -> (i32, i32) {
    %c0_i32 = arith.constant 0 : i32
    %c0_i32_0 = arith.constant 0 : i32
    %c0_i32_1 = arith.constant 0 : i32
    return %c0_i32, %c0_i32_0 : i32, i32
  }
}

</mosaic_0001>

<bundles_post_ra>
// kernel: ppo_forward.2
= control target key start
LH: loop header
LB: loop body
LE: loop exit
PB: predicated region body
PF: predicated region fallthrough
CT: control target
= control target key end

     0   :  { %v917_v0 = vmov 0.0|0.0   ;;  %vm918_vm0 = vmmov 0   ;;  %v919_v6 = vmov 0.0   ;;  %vm223_vm1 = vcmask 1043456   ;;  %s1501_s1 = inlined_call_operand.vmem [shape: f32[36,8], index: 1, kind: input, shape index: {}]   ;;  %s1502_s0 = inlined_call_operand.vmem [shape: f32[392,36], index: 0, kind: input, shape index: {}]   ;;  %s1503_s2 = inlined_call_operand.vmem [shape: f32[1,8], index: 2, kind: input, shape index: {}]   ;;  %s1504_s3 = inlined_call_operand.vmem [shape: f32[392,8], index: 3, kind: output, shape index: {}]  }
   0x1   :  { %902 = vmatprep.subr.bf16.mxu0 %v917_v0  ;;  %v63_v1 = vld [vmem:[%s1501_s1] sm:$0xff]  ;;  %v64_v2 = vld [vmem:[%s1501_s1 + $0x8] sm:$0xff]  ;;  %908 = vmatprep.subr.bf16.mxu1 %v917_v0  ;;  %v65_v3 = vld [vmem:[%s1501_s1 + $0x10] sm:$0xff]  ;;  %vm75_vm2 = vcmask 293888   ;;  %vm586_vm3 = vcmask 64512  }
   0x2   :  { %v903_v4 = vpack.c.bf16 %v64_v2, %v63_v1  ;;  %v66_v5 = vld [vmem:[%s1501_s1 + $0x18] sm:$0xff]  ;;  %755 = vmatprep.mubr.msk.f32.mxu0 %vm918_vm0, %v919_v6  ;;  %830 = vmatprep.mubr.msk.f32.mxu1 %vm918_vm0, %v919_v6  ;;  %v67_v8 = vld [vmem:[%s1501_s1 + $0x20] sm:$0xf]  ;;  %v39_v10 = vld [vmem:[%s1502_s0 + $0xc8] sm:$0xff] }
   0x3   :  { %v906_v7 = vpack.c.bf16 %v66_v5, %v65_v3  ;;  %v14_v9 = vld [vmem:[%s1502_s0] sm:$0xff]  ;;  %v15_v11 = vld [vmem:[%s1502_s0 + $0x8] sm:$0xff]  ;;  %v40_v12 = vld [vmem:[%s1502_s0 + $0xd0] sm:$0xff] }
   0x4   :  { %904 = vmatpush3.bf16.msra.mxu0 %v903_v4  ;;  %911 = vmatpush3.bf16.msra.mxu1 %v903_v4  ;;  %v16_v13 = vld [vmem:[%s1502_s0 + $0x10] sm:$0xff]  ;;  %v41_v14 = vld [vmem:[%s1502_s0 + $0xd8] sm:$0xff]  ;;  %v42_v16 = vld [vmem:[%s1502_s0 + $0xe0] sm:$0xff] }
   0x5   :  { %905 = vmatprep.subr.bf16.mxu0 %v917_v0  ;;  %909 = vmatprep.subr.bf16.mxu1 %v917_v0  ;;  %v17_v15 = vld [vmem:[%s1502_s0 + $0x18] sm:$0xff]  ;;  %v18_v17 = vld [vmem:[%s1502_s0 + $0x20] sm:$0xff]  ;;  %v43_v18 = vld [vmem:[%s1502_s0 + $0xe8] sm:$0xff] }
   0x6   :  { %v19_v19 = vld [vmem:[%s1502_s0 + $0x28] sm:$0xff]  ;;  %v44_v20 = vld [vmem:[%s1502_s0 + $0xf0] sm:$0xff]  ;;  %v45_v22 = vld [vmem:[%s1502_s0 + $0xf8] sm:$0xff] }
   0x7   :  { %v20_v21 = vld [vmem:[%s1502_s0 + $0x30] sm:$0xff]  ;;  %v21_v23 = vld [vmem:[%s1502_s0 + $0x38] sm:$0xff]  ;;  %v46_v24 = vld [vmem:[%s1502_s0 + $0x100] sm:$0xff] }
   0x8   :  { %907 = vmatpush3.bf16.msra.mxu0 %v906_v7  ;;  %912 = vmatpush3.bf16.msra.mxu1 %v906_v7  ;;  %v22_v25 = vld [vmem:[%s1502_s0 + $0x40] sm:$0xff]  ;;  %v47_v26 = vld [vmem:[%s1502_s0 + $0x108] sm:$0xff]  ;;  %v48_v28 = vld [vmem:[%s1502_s0 + $0x110] sm:$0xff] }
   0x9   :  { %753 = vmatprep.subr.mxu0 %v919_v6  ;;  %910 = vmatprep.subr.mxu1 %v919_v6  ;;  %v23_v27 = vld [vmem:[%s1502_s0 + $0x48] sm:$0xff]  ;;  %v24_v29 = vld [vmem:[%s1502_s0 + $0x50] sm:$0xff]  ;;  %v49_v30 = vld [vmem:[%s1502_s0 + $0x118] sm:$0xff] }
   0xa   :  { %v25_v31 = vld [vmem:[%s1502_s0 + $0x58] sm:$0xff]  ;;  %v50_v32 = vld [vmem:[%s1502_s0 + $0x120] sm:$0xff]  ;;  %v51_v34 = vld [vmem:[%s1502_s0 + $0x128] sm:$0xff] }
   0xb   :  { %v26_v33 = vld [vmem:[%s1502_s0 + $0x60] sm:$0xff]  ;;  %v27_v35 = vld [vmem:[%s1502_s0 + $0x68] sm:$0xff]  ;;  %v52_v36 = vld [vmem:[%s1502_s0 + $0x130] sm:$0xff] }
   0xc   :  { %754 = vmatpush3.msk.msra.mxu0 %vm223_vm1, %v67_v8  ;;  %913 = vmatpush3.msk.msra.mxu1 %vm223_vm1, %v67_v8  ;;  %v28_v37 = vld [vmem:[%s1502_s0 + $0x70] sm:$0xff]  ;;  %v53_v38 = vld [vmem:[%s1502_s0 + $0x138] sm:$0xff]  ;;  %v54_v40 = vld [vmem:[%s1502_s0 + $0x140] sm:$0xff] }
   0xd   :  { %756 = vmatmul.mubr.msk.f32.vlgmr.msra.gmra.mrb[0].mxu0 %vm75_vm2, %v14_v9  ;;  %831 = vmatmul.mubr.msk.f32.vlgmr.msra.gmra.mrb[0].mxu1 %vm75_vm2, %v39_v10  ;;  %v29_v39 = vld [vmem:[%s1502_s0 + $0x78] sm:$0xff]  ;;  %v30_v41 = vld [vmem:[%s1502_s0 + $0x80] sm:$0xff]  ;;  %v55_v42 = vld [vmem:[%s1502_s0 + $0x148] sm:$0xff] }
   0xe   :  { %758 = vmatprep.mubr.msk.f32.mxu0 %vm918_vm0, %v919_v6  ;;  %833 = vmatprep.mubr.msk.f32.mxu1 %vm918_vm0, %v919_v6  ;;  %v31_v43 = vld [vmem:[%s1502_s0 + $0x88] sm:$0xff]  ;;  %v56_v44 = vld [vmem:[%s1502_s0 + $0x150] sm:$0xff]  ;;  %v57_v46 = vld [vmem:[%s1502_s0 + $0x158] sm:$0xff] }
   0xf   :  { %v32_v45 = vld [vmem:[%s1502_s0 + $0x90] sm:$0xff]  ;;  %v33_v47 = vld [vmem:[%s1502_s0 + $0x98] sm:$0xff]  ;;  %v58_v48 = vld [vmem:[%s1502_s0 + $0x160] sm:$0xff] }
  0x10   :  { %v34_v49 = vld [vmem:[%s1502_s0 + $0xa0] sm:$0xff]  ;;  %v59_v50 = vld [vmem:[%s1502_s0 + $0x168] sm:$0xff]  ;;  %v60_v52 = vld [vmem:[%s1502_s0 + $0x170] sm:$0xff] }
  0x11   :  { %759 = vmatmul.mubr.msk.f32.gmra.mrb[2].mxu0 %vm75_vm2, %v15_v11  ;;  %834 = vmatmul.mubr.msk.f32.gmra.mrb[2].mxu1 %vm75_vm2, %v40_v12  ;;  %v35_v51 = vld [vmem:[%s1502_s0 + $0xa8] sm:$0xff]  ;;  %v36_v53 = vld [vmem:[%s1502_s0 + $0xb0] sm:$0xff]  ;;  %v61_v54 = vld [vmem:[%s1502_s0 + $0x178] sm:$0xff] }
  0x12   :  { %761 = vmatprep.mubr.msk.f32.mxu0 %vm918_vm0, %v919_v6  ;;  %836 = vmatprep.mubr.msk.f32.mxu1 %vm918_vm0, %v919_v6  ;;  %v37_v55 = vld [vmem:[%s1502_s0 + $0xb8] sm:$0xff]  ;;  %v62_v56 = vld [vmem:[%s1502_s0 + $0x180] sm:$0xff] }
  0x13   :  { %v38_v57 = vld [vmem:[%s1502_s0 + $0xc0] sm:$0xff] }
  0x14   :  { %v1254_v58 = vld [vmem:[%s1503_s2] ss:$0 sm:$0xff] }
  0x15   :  { %762 = vmatmul.mubr.msk.f32.gmra.mrb[4].mxu0 %vm75_vm2, %v16_v13  ;;  %837 = vmatmul.mubr.msk.f32.gmra.mrb[4].mxu1 %vm75_vm2, %v41_v14 }
  0x16   :  { %764 = vmatprep.mubr.msk.f32.mxu0 %vm918_vm0, %v919_v6  ;;  %839 = vmatprep.mubr.msk.f32.mxu1 %vm918_vm0, %v919_v6 }
  0x19   :  { %765 = vmatmul.mubr.msk.f32.gmra.mrb[6].mxu0 %vm75_vm2, %v17_v15  ;;  %840 = vmatmul.mubr.msk.f32.gmra.mrb[6].mxu1 %vm75_vm2, %v42_v16 }
  0x1a   :  { %767 = vmatprep.mubr.msk.f32.mxu0 %vm918_vm0, %v919_v6  ;;  %842 = vmatprep.mubr.msk.f32.mxu1 %vm918_vm0, %v919_v6 }
  0x1d   :  { %768 = vmatmul.mubr.msk.f32.gmra.mrb[8].mxu0 %vm75_vm2, %v18_v17  ;;  %843 = vmatmul.mubr.msk.f32.gmra.mrb[8].mxu1 %vm75_vm2, %v43_v18 }
  0x1e   :  { %770 = vmatprep.mubr.msk.f32.mxu0 %vm918_vm0, %v919_v6  ;;  %845 = vmatprep.mubr.msk.f32.mxu1 %vm918_vm0, %v919_v6 }
  0x21   :  { %771 = vmatmul.mubr.msk.f32.gmra.mrb[10].mxu0 %vm75_vm2, %v19_v19  ;;  %846 = vmatmul.mubr.msk.f32.gmra.mrb[10].mxu1 %vm75_vm2, %v44_v20 }
  0x22   :  { %773 = vmatprep.mubr.msk.f32.mxu0 %vm918_vm0, %v919_v6  ;;  %848 = vmatprep.mubr.msk.f32.mxu1 %vm918_vm0, %v919_v6 }
  0x25   :  { %774 = vmatmul.mubr.msk.f32.gmra.mrb[12].mxu0 %vm75_vm2, %v20_v21  ;;  %849 = vmatmul.mubr.msk.f32.gmra.mrb[12].mxu1 %vm75_vm2, %v45_v22 }
  0x26   :  { %776 = vmatprep.mubr.msk.f32.mxu0 %vm918_vm0, %v919_v6  ;;  %851 = vmatprep.mubr.msk.f32.mxu1 %vm918_vm0, %v919_v6 }
  0x29   :  { %777 = vmatmul.mubr.msk.f32.gmra.mrb[14].mxu0 %vm75_vm2, %v21_v23  ;;  %852 = vmatmul.mubr.msk.f32.gmra.mrb[14].mxu1 %vm75_vm2, %v46_v24 }
  0x2a   :  { %779 = vmatprep.mubr.msk.f32.mxu0 %vm918_vm0, %v919_v6  ;;  %854 = vmatprep.mubr.msk.f32.mxu1 %vm918_vm0, %v919_v6 }
  0x2d   :  { %780 = vmatmul.mubr.msk.f32.gmra.mrb[16].mxu0 %vm75_vm2, %v22_v25  ;;  %855 = vmatmul.mubr.msk.f32.gmra.mrb[16].mxu1 %vm75_vm2, %v47_v26 }
  0x2e   :  { %782 = vmatprep.mubr.msk.f32.mxu0 %vm918_vm0, %v919_v6  ;;  %857 = vmatprep.mubr.msk.f32.mxu1 %vm918_vm0, %v919_v6 }
  0x31   :  { %783 = vmatmul.mubr.msk.f32.gmra.mrb[18].mxu0 %vm75_vm2, %v23_v27  ;;  %858 = vmatmul.mubr.msk.f32.gmra.mrb[18].mxu1 %vm75_vm2, %v48_v28 }
  0x32   :  { %785 = vmatprep.mubr.msk.f32.mxu0 %vm918_vm0, %v919_v6  ;;  %860 = vmatprep.mubr.msk.f32.mxu1 %vm918_vm0, %v919_v6 }
  0x35   :  { %786 = vmatmul.mubr.msk.f32.gmra.mrb[20].mxu0 %vm75_vm2, %v24_v29  ;;  %861 = vmatmul.mubr.msk.f32.gmra.mrb[20].mxu1 %vm75_vm2, %v49_v30 }
  0x36   :  { %788 = vmatprep.mubr.msk.f32.mxu0 %vm918_vm0, %v919_v6  ;;  %863 = vmatprep.mubr.msk.f32.mxu1 %vm918_vm0, %v919_v6 }
  0x39   :  { %789 = vmatmul.mubr.msk.f32.gmra.mrb[22].mxu0 %vm75_vm2, %v25_v31  ;;  %864 = vmatmul.mubr.msk.f32.gmra.mrb[22].mxu1 %vm75_vm2, %v50_v32 }
  0x3a   :  { %791 = vmatprep.mubr.msk.f32.mxu0 %vm918_vm0, %v919_v6  ;;  %866 = vmatprep.mubr.msk.f32.mxu1 %vm918_vm0, %v919_v6 }
  0x3d   :  { %792 = vmatmul.mubr.msk.f32.gmra.mrb[24].mxu0 %vm75_vm2, %v26_v33  ;;  %867 = vmatmul.mubr.msk.f32.gmra.mrb[24].mxu1 %vm75_vm2, %v51_v34 }
  0x3e   :  { %794 = vmatprep.mubr.msk.f32.mxu0 %vm918_vm0, %v919_v6  ;;  %869 = vmatprep.mubr.msk.f32.mxu1 %vm918_vm0, %v919_v6 }
  0x41   :  { %795 = vmatmul.mubr.msk.f32.gmra.mrb[26].mxu0 %vm75_vm2, %v27_v35  ;;  %870 = vmatmul.mubr.msk.f32.gmra.mrb[26].mxu1 %vm75_vm2, %v52_v36 }
  0x42   :  { %797 = vmatprep.mubr.msk.f32.mxu0 %vm918_vm0, %v919_v6  ;;  %872 = vmatprep.mubr.msk.f32.mxu1 %vm918_vm0, %v919_v6 }
  0x45   :  { %798 = vmatmul.mubr.msk.f32.gmra.mrb[28].mxu0 %vm75_vm2, %v28_v37  ;;  %873 = vmatmul.mubr.msk.f32.gmra.mrb[28].mxu1 %vm75_vm2, %v53_v38 }
  0x46   :  { %800 = vmatprep.mubr.msk.f32.mxu0 %vm918_vm0, %v919_v6  ;;  %875 = vmatprep.mubr.msk.f32.mxu1 %vm918_vm0, %v919_v6 }
  0x49   :  { %801 = vmatmul.mubr.msk.f32.gmra.mrb[30].mxu0 %vm75_vm2, %v29_v39  ;;  %876 = vmatmul.mubr.msk.f32.gmra.mrb[30].mxu1 %vm75_vm2, %v54_v40 }
  0x4a   :  { %803 = vmatprep.mubr.msk.f32.mxu0 %vm918_vm0, %v919_v6  ;;  %878 = vmatprep.mubr.msk.f32.mxu1 %vm918_vm0, %v919_v6 }
  0x4d   :  { %804 = vmatmul.mubr.msk.f32.gmra.mrb[32].mxu0 %vm75_vm2, %v30_v41  ;;  %879 = vmatmul.mubr.msk.f32.gmra.mrb[32].mxu1 %vm75_vm2, %v55_v42 }
  0x4e   :  { %806 = vmatprep.mubr.msk.f32.mxu0 %vm918_vm0, %v919_v6  ;;  %881 = vmatprep.mubr.msk.f32.mxu1 %vm918_vm0, %v919_v6 }
  0x51   :  { %807 = vmatmul.mubr.msk.f32.gmra.mrb[34].mxu0 %vm75_vm2, %v31_v43  ;;  %882 = vmatmul.mubr.msk.f32.gmra.mrb[34].mxu1 %vm75_vm2, %v56_v44 }
  0x52   :  { %809 = vmatprep.mubr.msk.f32.mxu0 %vm918_vm0, %v919_v6  ;;  %884 = vmatprep.mubr.msk.f32.mxu1 %vm918_vm0, %v919_v6 }
  0x55   :  { %810 = vmatmul.mubr.msk.f32.gmra.mrb[36].mxu0 %vm75_vm2, %v32_v45  ;;  %885 = vmatmul.mubr.msk.f32.gmra.mrb[36].mxu1 %vm75_vm2, %v57_v46 }
  0x56   :  { %812 = vmatprep.mubr.msk.f32.mxu0 %vm918_vm0, %v919_v6  ;;  %887 = vmatprep.mubr.msk.f32.mxu1 %vm918_vm0, %v919_v6 }
  0x59   :  { %813 = vmatmul.mubr.msk.f32.gmra.mrb[38].mxu0 %vm75_vm2, %v33_v47  ;;  %888 = vmatmul.mubr.msk.f32.gmra.mrb[38].mxu1 %vm75_vm2, %v58_v48 }
  0x5a   :  { %815 = vmatprep.mubr.msk.f32.mxu0 %vm918_vm0, %v919_v6  ;;  %890 = vmatprep.mubr.msk.f32.mxu1 %vm918_vm0, %v919_v6 }
  0x5d   :  { %816 = vmatmul.mubr.msk.f32.gmra.mrb[40].mxu0 %vm75_vm2, %v34_v49  ;;  %891 = vmatmul.mubr.msk.f32.gmra.mrb[40].mxu1 %vm75_vm2, %v59_v50 }
  0x5e   :  { %818 = vmatprep.mubr.msk.f32.mxu0 %vm918_vm0, %v919_v6  ;;  %893 = vmatprep.mubr.msk.f32.mxu1 %vm918_vm0, %v919_v6 }
  0x61   :  { %819 = vmatmul.mubr.msk.f32.gmra.mrb[42].mxu0 %vm75_vm2, %v35_v51  ;;  %894 = vmatmul.mubr.msk.f32.gmra.mrb[42].mxu1 %vm75_vm2, %v60_v52 }
  0x62   :  { %821 = vmatprep.mubr.msk.f32.mxu0 %vm918_vm0, %v919_v6  ;;  %896 = vmatprep.mubr.msk.f32.mxu1 %vm918_vm0, %v919_v6 }
  0x65   :  { %822 = vmatmul.mubr.msk.f32.gmra.mrb[44].mxu0 %vm75_vm2, %v36_v53  ;;  %897 = vmatmul.mubr.msk.f32.gmra.mrb[44].mxu1 %vm75_vm2, %v61_v54 }
  0x66   :  { %824 = vmatprep.mubr.msk.f32.mxu0 %vm918_vm0, %v919_v6  ;;  %899 = vmatprep.mubr.msk.f32.mxu1 %vm918_vm0, %v919_v6 }
  0x69   :  { %825 = vmatmul.mubr.msk.f32.gmra.mrb[46].mxu0 %vm75_vm2, %v37_v55  ;;  %900 = vmatmul.mubr.msk.f32.gmra.mrb[46].mxu1 %vm75_vm2, %v62_v56 }
  0x6a   :  { %827 = vmatprep.mubr.msk.f32.mxu0 %vm918_vm0, %v919_v6 }
  0x6d   :  { %828 = vmatmul.mubr.msk.f32.gmra.mrb[48].mxu0 %vm75_vm2, %v38_v57 }
  0xe0   :  { %v293_v59 = vpop.f32.mrb[0].mxu0  ;;  %v418_v60 = vpop.f32.mrb[0].mxu1 }
  0xe1   :  { %v294_v61 = vadd.f32 %v1254_v58, %v293_v59  ;;  %v757_v62 = vpop.f32.mrb[1].mxu0  ;;  %v419_v63 = vadd.f32 %v1254_v58, %v418_v60  ;;  %v832_v0 = vpop.f32.mrb[1].mxu1 }
  0xe3   :  { %v537_v1 = vmax.f32 %v294_v61, 0.0  ;;  %v562_v2 = vmax.f32 %v419_v63, 0.0 }
  0xe4   :  { %v298_v3 = vpop.f32.mrb[2].mxu0  ;;  %v423_v4 = vpop.f32.mrb[2].mxu1 }
  0xe5   :  { %587 = vst.msk [vmem:[%s1504_s3] sm:$0xff] %vm586_vm3, %v537_v1  ;;  %612 = vst.msk [vmem:[%s1504_s3 + $0xc8] sm:$0xff] %vm586_vm3, %v562_v2  ;;  %v299_v5 = vadd.f32 %v1254_v58, %v298_v3  ;;  %v760_v6 = vpop.f32.mrb[3].mxu0  ;;  %v424_v7 = vadd.f32 %v1254_v58, %v423_v4  ;;  %v835_v8 = vpop.f32.mrb[3].mxu1 }
  0xe7   :  { %v538_v9 = vmax.f32 %v299_v5, 0.0  ;;  %v563_v10 = vmax.f32 %v424_v7, 0.0 }
  0xe8   :  { %v303_v11 = vpop.f32.mrb[4].mxu0  ;;  %v428_v12 = vpop.f32.mrb[4].mxu1 }
  0xe9   :  { %588 = vst.msk [vmem:[%s1504_s3 + $0x8] sm:$0xff] %vm586_vm3, %v538_v9  ;;  %613 = vst.msk [vmem:[%s1504_s3 + $0xd0] sm:$0xff] %vm586_vm3, %v563_v10  ;;  %v304_v13 = vadd.f32 %v1254_v58, %v303_v11  ;;  %v763_v14 = vpop.f32.mrb[5].mxu0  ;;  %v429_v15 = vadd.f32 %v1254_v58, %v428_v12  ;;  %v838_v16 = vpop.f32.mrb[5].mxu1 }
  0xeb   :  { %v539_v17 = vmax.f32 %v304_v13, 0.0  ;;  %v564_v18 = vmax.f32 %v429_v15, 0.0 }
  0xec   :  { %v308_v19 = vpop.f32.mrb[6].mxu0  ;;  %v433_v20 = vpop.f32.mrb[6].mxu1 }
  0xed   :  { %589 = vst.msk [vmem:[%s1504_s3 + $0x10] sm:$0xff] %vm586_vm3, %v539_v17  ;;  %614 = vst.msk [vmem:[%s1504_s3 + $0xd8] sm:$0xff] %vm586_vm3, %v564_v18  ;;  %v309_v21 = vadd.f32 %v1254_v58, %v308_v19  ;;  %v766_v22 = vpop.f32.mrb[7].mxu0  ;;  %v434_v23 = vadd.f32 %v1254_v58, %v433_v20  ;;  %v841_v24 = vpop.f32.mrb[7].mxu1 }
  0xef   :  { %v540_v25 = vmax.f32 %v309_v21, 0.0  ;;  %v565_v26 = vmax.f32 %v434_v23, 0.0 }
  0xf0   :  { %v313_v27 = vpop.f32.mrb[8].mxu0  ;;  %v438_v28 = vpop.f32.mrb[8].mxu1 }
  0xf1   :  { %590 = vst.msk [vmem:[%s1504_s3 + $0x18] sm:$0xff] %vm586_vm3, %v540_v25  ;;  %615 = vst.msk [vmem:[%s1504_s3 + $0xe0] sm:$0xff] %vm586_vm3, %v565_v26  ;;  %v314_v29 = vadd.f32 %v1254_v58, %v313_v27  ;;  %v769_v30 = vpop.f32.mrb[9].mxu0  ;;  %v439_v31 = vadd.f32 %v1254_v58, %v438_v28  ;;  %v844_v32 = vpop.f32.mrb[9].mxu1 }
  0xf3   :  { %v541_v33 = vmax.f32 %v314_v29, 0.0  ;;  %v566_v34 = vmax.f32 %v439_v31, 0.0 }
  0xf4   :  { %v318_v35 = vpop.f32.mrb[10].mxu0  ;;  %v443_v36 = vpop.f32.mrb[10].mxu1 }
  0xf5   :  { %591 = vst.msk [vmem:[%s1504_s3 + $0x20] sm:$0xff] %vm586_vm3, %v541_v33  ;;  %616 = vst.msk [vmem:[%s1504_s3 + $0xe8] sm:$0xff] %vm586_vm3, %v566_v34  ;;  %v319_v37 = vadd.f32 %v1254_v58, %v318_v35  ;;  %v772_v38 = vpop.f32.mrb[11].mxu0  ;;  %v444_v39 = vadd.f32 %v1254_v58, %v443_v36  ;;  %v847_v40 = vpop.f32.mrb[11].mxu1 }
  0xf7   :  { %v542_v41 = vmax.f32 %v319_v37, 0.0  ;;  %v567_v42 = vmax.f32 %v444_v39, 0.0 }
  0xf8   :  { %v323_v43 = vpop.f32.mrb[12].mxu0  ;;  %v448_v44 = vpop.f32.mrb[12].mxu1 }
  0xf9   :  { %592 = vst.msk [vmem:[%s1504_s3 + $0x28] sm:$0xff] %vm586_vm3, %v542_v41  ;;  %617 = vst.msk [vmem:[%s1504_s3 + $0xf0] sm:$0xff] %vm586_vm3, %v567_v42  ;;  %v324_v45 = vadd.f32 %v1254_v58, %v323_v43  ;;  %v775_v46 = vpop.f32.mrb[13].mxu0  ;;  %v449_v47 = vadd.f32 %v1254_v58, %v448_v44  ;;  %v850_v48 = vpop.f32.mrb[13].mxu1 }
  0xfb   :  { %v543_v49 = vmax.f32 %v324_v45, 0.0  ;;  %v568_v50 = vmax.f32 %v449_v47, 0.0 }
  0xfc   :  { %v328_v51 = vpop.f32.mrb[14].mxu0  ;;  %v453_v52 = vpop.f32.mrb[14].mxu1 }
  0xfd   :  { %593 = vst.msk [vmem:[%s1504_s3 + $0x30] sm:$0xff] %vm586_vm3, %v543_v49  ;;  %618 = vst.msk [vmem:[%s1504_s3 + $0xf8] sm:$0xff] %vm586_vm3, %v568_v50  ;;  %v329_v53 = vadd.f32 %v1254_v58, %v328_v51  ;;  %v778_v54 = vpop.f32.mrb[15].mxu0  ;;  %v454_v55 = vadd.f32 %v1254_v58, %v453_v52  ;;  %v853_v56 = vpop.f32.mrb[15].mxu1 }
  0xff   :  { %v544_v57 = vmax.f32 %v329_v53, 0.0  ;;  %v569_v59 = vmax.f32 %v454_v55, 0.0 }
 0x100   :  { %v333_v60 = vpop.f32.mrb[16].mxu0  ;;  %v458_v61 = vpop.f32.mrb[16].mxu1 }
 0x101   :  { %594 = vst.msk [vmem:[%s1504_s3 + $0x38] sm:$0xff] %vm586_vm3, %v544_v57  ;;  %619 = vst.msk [vmem:[%s1504_s3 + $0x100] sm:$0xff] %vm586_vm3, %v569_v59  ;;  %v334_v62 = vadd.f32 %v1254_v58, %v333_v60  ;;  %v781_v63 = vpop.f32.mrb[17].mxu0  ;;  %v459_v0 = vadd.f32 %v1254_v58, %v458_v61  ;;  %v856_v1 = vpop.f32.mrb[17].mxu1 }
 0x103   :  { %v545_v2 = vmax.f32 %v334_v62, 0.0  ;;  %v570_v3 = vmax.f32 %v459_v0, 0.0 }
 0x104   :  { %v338_v4 = vpop.f32.mrb[18].mxu0  ;;  %v463_v5 = vpop.f32.mrb[18].mxu1 }
 0x105   :  { %595 = vst.msk [vmem:[%s1504_s3 + $0x40] sm:$0xff] %vm586_vm3, %v545_v2  ;;  %620 = vst.msk [vmem:[%s1504_s3 + $0x108] sm:$0xff] %vm586_vm3, %v570_v3  ;;  %v339_v6 = vadd.f32 %v1254_v58, %v338_v4  ;;  %v784_v7 = vpop.f32.mrb[19].mxu0  ;;  %v464_v8 = vadd.f32 %v1254_v58, %v463_v5  ;;  %v859_v9 = vpop.f32.mrb[19].mxu1 }
 0x107   :  { %v546_v10 = vmax.f32 %v339_v6, 0.0  ;;  %v571_v11 = vmax.f32 %v464_v8, 0.0 }
 0x108   :  { %v343_v12 = vpop.f32.mrb[20].mxu0  ;;  %v468_v13 = vpop.f32.mrb[20].mxu1 }
 0x109   :  { %596 = vst.msk [vmem:[%s1504_s3 + $0x48] sm:$0xff] %vm586_vm3, %v546_v10  ;;  %621 = vst.msk [vmem:[%s1504_s3 + $0x110] sm:$0xff] %vm586_vm3, %v571_v11  ;;  %v344_v14 = vadd.f32 %v1254_v58, %v343_v12  ;;  %v787_v15 = vpop.f32.mrb[21].mxu0  ;;  %v469_v16 = vadd.f32 %v1254_v58, %v468_v13  ;;  %v862_v17 = vpop.f32.mrb[21].mxu1 }
 0x10b   :  { %v547_v18 = vmax.f32 %v344_v14, 0.0  ;;  %v572_v19 = vmax.f32 %v469_v16, 0.0 }
 0x10c   :  { %v348_v20 = vpop.f32.mrb[22].mxu0  ;;  %v473_v21 = vpop.f32.mrb[22].mxu1 }
 0x10d   :  { %597 = vst.msk [vmem:[%s1504_s3 + $0x50] sm:$0xff] %vm586_vm3, %v547_v18  ;;  %622 = vst.msk [vmem:[%s1504_s3 + $0x118] sm:$0xff] %vm586_vm3, %v572_v19  ;;  %v349_v22 = vadd.f32 %v1254_v58, %v348_v20  ;;  %v790_v23 = vpop.f32.mrb[23].mxu0  ;;  %v474_v24 = vadd.f32 %v1254_v58, %v473_v21  ;;  %v865_v25 = vpop.f32.mrb[23].mxu1 }
 0x10f   :  { %v548_v26 = vmax.f32 %v349_v22, 0.0  ;;  %v573_v27 = vmax.f32 %v474_v24, 0.0 }
 0x110   :  { %v353_v28 = vpop.f32.mrb[24].mxu0  ;;  %v478_v29 = vpop.f32.mrb[24].mxu1 }
 0x111   :  { %598 = vst.msk [vmem:[%s1504_s3 + $0x58] sm:$0xff] %vm586_vm3, %v548_v26  ;;  %623 = vst.msk [vmem:[%s1504_s3 + $0x120] sm:$0xff] %vm586_vm3, %v573_v27  ;;  %v354_v30 = vadd.f32 %v1254_v58, %v353_v28  ;;  %v793_v31 = vpop.f32.mrb[25].mxu0  ;;  %v479_v32 = vadd.f32 %v1254_v58, %v478_v29  ;;  %v868_v33 = vpop.f32.mrb[25].mxu1 }
 0x113   :  { %v549_v34 = vmax.f32 %v354_v30, 0.0  ;;  %v574_v35 = vmax.f32 %v479_v32, 0.0 }
 0x114   :  { %v358_v36 = vpop.f32.mrb[26].mxu0  ;;  %v483_v37 = vpop.f32.mrb[26].mxu1 }
 0x115   :  { %599 = vst.msk [vmem:[%s1504_s3 + $0x60] sm:$0xff] %vm586_vm3, %v549_v34  ;;  %624 = vst.msk [vmem:[%s1504_s3 + $0x128] sm:$0xff] %vm586_vm3, %v574_v35  ;;  %v359_v38 = vadd.f32 %v1254_v58, %v358_v36  ;;  %v796_v39 = vpop.f32.mrb[27].mxu0  ;;  %v484_v40 = vadd.f32 %v1254_v58, %v483_v37  ;;  %v871_v41 = vpop.f32.mrb[27].mxu1 }
 0x117   :  { %v550_v42 = vmax.f32 %v359_v38, 0.0  ;;  %v575_v43 = vmax.f32 %v484_v40, 0.0 }
 0x118   :  { %v363_v44 = vpop.f32.mrb[28].mxu0  ;;  %v488_v45 = vpop.f32.mrb[28].mxu1 }
 0x119   :  { %600 = vst.msk [vmem:[%s1504_s3 + $0x68] sm:$0xff] %vm586_vm3, %v550_v42  ;;  %625 = vst.msk [vmem:[%s1504_s3 + $0x130] sm:$0xff] %vm586_vm3, %v575_v43  ;;  %v364_v46 = vadd.f32 %v1254_v58, %v363_v44  ;;  %v799_v47 = vpop.f32.mrb[29].mxu0  ;;  %v489_v48 = vadd.f32 %v1254_v58, %v488_v45  ;;  %v874_v49 = vpop.f32.mrb[29].mxu1 }
 0x11b   :  { %v551_v50 = vmax.f32 %v364_v46, 0.0  ;;  %v576_v51 = vmax.f32 %v489_v48, 0.0 }
 0x11c   :  { %v368_v52 = vpop.f32.mrb[30].mxu0  ;;  %v493_v53 = vpop.f32.mrb[30].mxu1 }
 0x11d   :  { %601 = vst.msk [vmem:[%s1504_s3 + $0x70] sm:$0xff] %vm586_vm3, %v551_v50  ;;  %626 = vst.msk [vmem:[%s1504_s3 + $0x138] sm:$0xff] %vm586_vm3, %v576_v51  ;;  %v369_v54 = vadd.f32 %v1254_v58, %v368_v52  ;;  %v802_v55 = vpop.f32.mrb[31].mxu0  ;;  %v494_v56 = vadd.f32 %v1254_v58, %v493_v53  ;;  %v877_v57 = vpop.f32.mrb[31].mxu1 }
 0x11f   :  { %v552_v59 = vmax.f32 %v369_v54, 0.0  ;;  %v577_v60 = vmax.f32 %v494_v56, 0.0 }
 0x120   :  { %v373_v61 = vpop.f32.mrb[32].mxu0  ;;  %v498_v62 = vpop.f32.mrb[32].mxu1 }
 0x121   :  { %602 = vst.msk [vmem:[%s1504_s3 + $0x78] sm:$0xff] %vm586_vm3, %v552_v59  ;;  %627 = vst.msk [vmem:[%s1504_s3 + $0x140] sm:$0xff] %vm586_vm3, %v577_v60  ;;  %v374_v63 = vadd.f32 %v1254_v58, %v373_v61  ;;  %v805_v0 = vpop.f32.mrb[33].mxu0  ;;  %v499_v1 = vadd.f32 %v1254_v58, %v498_v62  ;;  %v880_v2 = vpop.f32.mrb[33].mxu1 }
 0x123   :  { %v553_v3 = vmax.f32 %v374_v63, 0.0  ;;  %v578_v4 = vmax.f32 %v499_v1, 0.0 }
 0x124   :  { %v378_v5 = vpop.f32.mrb[34].mxu0  ;;  %v503_v6 = vpop.f32.mrb[34].mxu1 }
 0x125   :  { %603 = vst.msk [vmem:[%s1504_s3 + $0x80] sm:$0xff] %vm586_vm3, %v553_v3  ;;  %628 = vst.msk [vmem:[%s1504_s3 + $0x148] sm:$0xff] %vm586_vm3, %v578_v4  ;;  %v379_v7 = vadd.f32 %v1254_v58, %v378_v5  ;;  %v808_v8 = vpop.f32.mrb[35].mxu0  ;;  %v504_v9 = vadd.f32 %v1254_v58, %v503_v6  ;;  %v883_v10 = vpop.f32.mrb[35].mxu1 }
 0x127   :  { %v554_v11 = vmax.f32 %v379_v7, 0.0  ;;  %v579_v12 = vmax.f32 %v504_v9, 0.0 }
 0x128   :  { %v383_v13 = vpop.f32.mrb[36].mxu0  ;;  %v508_v14 = vpop.f32.mrb[36].mxu1 }
 0x129   :  { %604 = vst.msk [vmem:[%s1504_s3 + $0x88] sm:$0xff] %vm586_vm3, %v554_v11  ;;  %629 = vst.msk [vmem:[%s1504_s3 + $0x150] sm:$0xff] %vm586_vm3, %v579_v12  ;;  %v384_v15 = vadd.f32 %v1254_v58, %v383_v13  ;;  %v811_v16 = vpop.f32.mrb[37].mxu0  ;;  %v509_v17 = vadd.f32 %v1254_v58, %v508_v14  ;;  %v886_v18 = vpop.f32.mrb[37].mxu1 }
 0x12b   :  { %v555_v19 = vmax.f32 %v384_v15, 0.0  ;;  %v580_v20 = vmax.f32 %v509_v17, 0.0 }
 0x12c   :  { %v388_v21 = vpop.f32.mrb[38].mxu0  ;;  %v513_v22 = vpop.f32.mrb[38].mxu1 }
 0x12d   :  { %605 = vst.msk [vmem:[%s1504_s3 + $0x90] sm:$0xff] %vm586_vm3, %v555_v19  ;;  %630 = vst.msk [vmem:[%s1504_s3 + $0x158] sm:$0xff] %vm586_vm3, %v580_v20  ;;  %v389_v23 = vadd.f32 %v1254_v58, %v388_v21  ;;  %v814_v24 = vpop.f32.mrb[39].mxu0  ;;  %v514_v25 = vadd.f32 %v1254_v58, %v513_v22  ;;  %v889_v26 = vpop.f32.mrb[39].mxu1 }
 0x12f   :  { %v556_v27 = vmax.f32 %v389_v23, 0.0  ;;  %v581_v28 = vmax.f32 %v514_v25, 0.0 }
 0x130   :  { %v393_v29 = vpop.f32.mrb[40].mxu0  ;;  %v518_v30 = vpop.f32.mrb[40].mxu1 }
 0x131   :  { %606 = vst.msk [vmem:[%s1504_s3 + $0x98] sm:$0xff] %vm586_vm3, %v556_v27  ;;  %631 = vst.msk [vmem:[%s1504_s3 + $0x160] sm:$0xff] %vm586_vm3, %v581_v28  ;;  %v394_v31 = vadd.f32 %v1254_v58, %v393_v29  ;;  %v817_v32 = vpop.f32.mrb[41].mxu0  ;;  %v519_v33 = vadd.f32 %v1254_v58, %v518_v30  ;;  %v892_v34 = vpop.f32.mrb[41].mxu1 }
 0x133   :  { %v557_v35 = vmax.f32 %v394_v31, 0.0  ;;  %v582_v36 = vmax.f32 %v519_v33, 0.0 }
 0x134   :  { %v398_v37 = vpop.f32.mrb[42].mxu0  ;;  %v523_v38 = vpop.f32.mrb[42].mxu1 }
 0x135   :  { %607 = vst.msk [vmem:[%s1504_s3 + $0xa0] sm:$0xff] %vm586_vm3, %v557_v35  ;;  %632 = vst.msk [vmem:[%s1504_s3 + $0x168] sm:$0xff] %vm586_vm3, %v582_v36  ;;  %v399_v39 = vadd.f32 %v1254_v58, %v398_v37  ;;  %v820_v40 = vpop.f32.mrb[43].mxu0  ;;  %v524_v41 = vadd.f32 %v1254_v58, %v523_v38  ;;  %v895_v42 = vpop.f32.mrb[43].mxu1 }
 0x137   :  { %v558_v43 = vmax.f32 %v399_v39, 0.0  ;;  %v583_v44 = vmax.f32 %v524_v41, 0.0 }
 0x138   :  { %v403_v45 = vpop.f32.mrb[44].mxu0  ;;  %v528_v46 = vpop.f32.mrb[44].mxu1 }
 0x139   :  { %608 = vst.msk [vmem:[%s1504_s3 + $0xa8] sm:$0xff] %vm586_vm3, %v558_v43  ;;  %633 = vst.msk [vmem:[%s1504_s3 + $0x170] sm:$0xff] %vm586_vm3, %v583_v44  ;;  %v404_v47 = vadd.f32 %v1254_v58, %v403_v45  ;;  %v823_v48 = vpop.f32.mrb[45].mxu0  ;;  %v529_v49 = vadd.f32 %v1254_v58, %v528_v46  ;;  %v898_v50 = vpop.f32.mrb[45].mxu1 }
 0x13b   :  { %v559_v51 = vmax.f32 %v404_v47, 0.0  ;;  %v584_v52 = vmax.f32 %v529_v49, 0.0 }
 0x13c   :  { %v408_v53 = vpop.f32.mrb[46].mxu0  ;;  %v533_v54 = vpop.f32.mrb[46].mxu1 }
 0x13d   :  { %609 = vst.msk [vmem:[%s1504_s3 + $0xb0] sm:$0xff] %vm586_vm3, %v559_v51  ;;  %634 = vst.msk [vmem:[%s1504_s3 + $0x178] sm:$0xff] %vm586_vm3, %v584_v52  ;;  %v409_v55 = vadd.f32 %v1254_v58, %v408_v53  ;;  %v826_v56 = vpop.f32.mrb[47].mxu0  ;;  %v534_v57 = vadd.f32 %v1254_v58, %v533_v54  ;;  %v901_v59 = vpop.f32.mrb[47].mxu1 }
 0x13f   :  { %v560_v60 = vmax.f32 %v409_v55, 0.0  ;;  %v585_v61 = vmax.f32 %v534_v57, 0.0 }
 0x140   :  { %v413_v62 = vpop.f32.mrb[48].mxu0 }
 0x141   :  { %610 = vst.msk [vmem:[%s1504_s3 + $0xb8] sm:$0xff] %vm586_vm3, %v560_v60  ;;  %635 = vst.msk [vmem:[%s1504_s3 + $0x180] sm:$0xff] %vm586_vm3, %v585_v61  ;;  %v414_v63 = vadd.f32 %v1254_v58, %v413_v62  ;;  %v829_v0 = vpop.f32.mrb[49].mxu0 }
 0x143   :  { %v561_v1 = vmax.f32 %v414_v63, 0.0 }
 0x145   :  { %611 = vst.msk [vmem:[%s1504_s3 + $0xc0] sm:$0xff] %vm586_vm3, %v561_v1 }

// kernel: ppo_forward.3
= control target key start
LH: loop header
LB: loop body
LE: loop exit
PB: predicated region body
PF: predicated region fallthrough
CT: control target
= control target key end

     0   :  { %v1525_v47 = vmov 1983009808   ;;  %v241_v49 = vlaneseq  ;;  %vm1527_vm0 = vmmov 0   ;;  %vm307_vm1 = vcmask 261120   ;;  %s2262_s1 = inlined_call_operand.vmem [shape: f32[1568,32], index: 1, kind: input, shape index: {}]   ;;  %s2263_s0 = inlined_call_operand.vmem [shape: f32[2,1568], index: 0, kind: input, shape index: {}]   ;;  %s2264_s3 = inlined_call_operand.vmem [shape: f32[32,64], index: 3, kind: input, shape index: {}]   ;;  %s2265_s2 = inlined_call_operand.vmem [shape: f32[1,32], index: 2, kind: input, shape index: {}]   ;;  %s2266_s5 = inlined_call_operand.vmem [shape: f32[64,128], index: 5, kind: input, shape index: {}]   ;;  %s2267_s4 = inlined_call_operand.vmem [shape: f32[1,64], index: 4, kind: input, shape index: {}]   ;;  %s2268_s6 = inlined_call_operand.vmem [shape: f32[1,128], index: 6, kind: input, shape index: {}]   ;;  %s2269_s7 = inlined_call_operand.vmem [shape: f32[2,128], index: 7, kind: output, shape index: {}]  }
   0x1   :  { %v46_v0 = vld [vmem:[%s2262_s1 + $0x80] sm:$0xff]  ;;  %v47_v1 = vld [vmem:[%s2262_s1 + $0x88] sm:$0xff]  ;;  %v48_v11 = vld [vmem:[%s2262_s1 + $0x90] sm:$0xff]  ;;  %v239_v48 = vunpack.c.l.s4 %v1525_v47  ;;  %vm907_vm2 = vcmask 523264   ;;  %vm985_vm4 = vcmask 1041408  }
   0x2   :  { %v78_v2 = vld [vmem:[%s2262_s1 + $0x180] sm:$0xff]  ;;  %v1291_v3 = vpack.c.bf16 %v47_v1, %v46_v0  ;;  %v79_v4 = vld [vmem:[%s2262_s1 + $0x188] sm:$0xff]  ;;  %v49_v13 = vld [vmem:[%s2262_s1 + $0x98] sm:$0xff]  ;;  %v242_v0 = vshrl.u32 %v241_v49, 7 }
   0x3   :  { %v30_v5 = vld [vmem:[%s2262_s1] sm:$0xff]  ;;  %v31_v6 = vld [vmem:[%s2262_s1 + $0x8] sm:$0xff]  ;;  %v1323_v7 = vpack.c.bf16 %v79_v4, %v78_v2  ;;  %v80_v14 = vld [vmem:[%s2262_s1 + $0x190] sm:$0xff]  ;;  %v1295_v16 = vpack.c.bf16 %v49_v13, %v48_v11  ;;  %v240_v63 = vunpack.c.0.s8 %v239_v48 }
   0x4   :  { %v1293_v8 = vpack.c.bf16 %v31_v6, %v30_v5  ;;  %v62_v9 = vld [vmem:[%s2262_s1 + $0x100] sm:$0xff]  ;;  %v63_v10 = vld [vmem:[%s2262_s1 + $0x108] sm:$0xff]  ;;  %1292 = vmatprep.subr.bf16.mxu0 %v1291_v3  ;;  %v81_v15 = vld [vmem:[%s2262_s1 + $0x198] sm:$0xff] }
   0x5   :  { %v1325_v12 = vpack.c.bf16 %v63_v10, %v62_v9  ;;  %1324 = vmatprep.subr.bf16.mxu1 %v1323_v7  ;;  %v1327_v17 = vpack.c.bf16 %v81_v15, %v80_v14  ;;  %v32_v18 = vld [vmem:[%s2262_s1 + $0x10] sm:$0xff]  ;;  %v33_v19 = vld [vmem:[%s2262_s1 + $0x18] sm:$0xff]  ;;  %v50_v23 = vld [vmem:[%s2262_s1 + $0xa0] sm:$0xff]  ;;  %v1721_v13 = vsub.s32 %v240_v63, %v242_v0 }
   0x6   :  { %1294 = vmatpush3.bf16.msra.mxu0 %v1293_v8  ;;  %v64_v20 = vld [vmem:[%s2262_s1 + $0x110] sm:$0xff]  ;;  %v1297_v21 = vpack.c.bf16 %v33_v19, %v32_v18  ;;  %v65_v22 = vld [vmem:[%s2262_s1 + $0x118] sm:$0xff]  ;;  %v51_v24 = vld [vmem:[%s2262_s1 + $0xa8] sm:$0xff] }
   0x7   :  { %1326 = vmatpush3.bf16.msra.mxu1 %v1325_v12  ;;  %1296 = vmatprep.subr.bf16.mxu0 %v1295_v16  ;;  %v1329_v25 = vpack.c.bf16 %v65_v22, %v64_v20  ;;  %v1299_v26 = vpack.c.bf16 %v51_v24, %v50_v23  ;;  %v82_v27 = vld [vmem:[%s2262_s1 + $0x1a0] sm:$0xff]  ;;  %v83_v28 = vld [vmem:[%s2262_s1 + $0x1a8] sm:$0xff]  ;;  %v52_v35 = vld [vmem:[%s2262_s1 + $0xb0] sm:$0xff] }
   0x8   :  { %1328 = vmatprep.subr.bf16.mxu1 %v1327_v17  ;;  %v34_v29 = vld [vmem:[%s2262_s1 + $0x20] sm:$0xff]  ;;  %v1331_v30 = vpack.c.bf16 %v83_v28, %v82_v27  ;;  %v35_v31 = vld [vmem:[%s2262_s1 + $0x28] sm:$0xff]  ;;  %v53_v36 = vld [vmem:[%s2262_s1 + $0xb8] sm:$0xff] }
   0x9   :  { %v66_v32 = vld [vmem:[%s2262_s1 + $0x120] sm:$0xff]  ;;  %v67_v33 = vld [vmem:[%s2262_s1 + $0x128] sm:$0xff]  ;;  %v1301_v34 = vpack.c.bf16 %v35_v31, %v34_v29  ;;  %v84_v37 = vld [vmem:[%s2262_s1 + $0x1b0] sm:$0xff]  ;;  %v1303_v39 = vpack.c.bf16 %v53_v36, %v52_v35 }
   0xa   :  { %1298 = vmatpush3.bf16.msra.mxu0 %v1297_v21  ;;  %v1333_v38 = vpack.c.bf16 %v67_v33, %v66_v32  ;;  %v85_v40 = vld [vmem:[%s2262_s1 + $0x1b8] sm:$0xff]  ;;  %v36_v41 = vld [vmem:[%s2262_s1 + $0x30] sm:$0xff]  ;;  %v54_v46 = vld [vmem:[%s2262_s1 + $0xc0] sm:$0xff] }
   0xb   :  { %1330 = vmatpush3.bf16.msra.mxu1 %v1329_v25  ;;  %1300 = vmatprep.subr.bf16.mxu0 %v1299_v26  ;;  %v37_v42 = vld [vmem:[%s2262_s1 + $0x38] sm:$0xff]  ;;  %v1335_v43 = vpack.c.bf16 %v85_v40, %v84_v37  ;;  %v68_v44 = vld [vmem:[%s2262_s1 + $0x130] sm:$0xff]  ;;  %v55_v50 = vld [vmem:[%s2262_s1 + $0xc8] sm:$0xff] }
   0xc   :  { %1332 = vmatprep.subr.bf16.mxu1 %v1331_v30  ;;  %v69_v45 = vld [vmem:[%s2262_s1 + $0x138] sm:$0xff]  ;;  %v86_v51 = vld [vmem:[%s2262_s1 + $0x1c0] sm:$0xff]  ;;  %v87_v52 = vld [vmem:[%s2262_s1 + $0x1c8] sm:$0xff]  ;;  %v1305_v53 = vpack.c.bf16 %v37_v42, %v36_v41  ;;  %v1307_v55 = vpack.c.bf16 %v55_v50, %v54_v46 }
   0xd   :  { %v1337_v54 = vpack.c.bf16 %v69_v45, %v68_v44  ;;  %v38_v56 = vld [vmem:[%s2262_s1 + $0x40] sm:$0xff]  ;;  %v39_v57 = vld [vmem:[%s2262_s1 + $0x48] sm:$0xff]  ;;  %v1339_v59 = vpack.c.bf16 %v87_v52, %v86_v51  ;;  %v56_v61 = vld [vmem:[%s2262_s1 + $0xd0] sm:$0xff] }
   0xe   :  { %1302 = vmatpush3.bf16.msra.mxu0 %v1301_v34  ;;  %v70_v58 = vld [vmem:[%s2262_s1 + $0x140] sm:$0xff]  ;;  %v71_v60 = vld [vmem:[%s2262_s1 + $0x148] sm:$0xff]  ;;  %v57_v62 = vld [vmem:[%s2262_s1 + $0xd8] sm:$0xff]  ;;  %v1309_v3 = vpack.c.bf16 %v39_v57, %v38_v56 }
   0xf   :  { %1334 = vmatpush3.bf16.msra.mxu1 %v1333_v38  ;;  %1304 = vmatprep.subr.bf16.mxu0 %v1303_v39  ;;  %v88_v1 = vld [vmem:[%s2262_s1 + $0x1d0] sm:$0xff]  ;;  %v89_v2 = vld [vmem:[%s2262_s1 + $0x1d8] sm:$0xff]  ;;  %v1341_v4 = vpack.c.bf16 %v71_v60, %v70_v58  ;;  %v1311_v5 = vpack.c.bf16 %v57_v62, %v56_v61  ;;  %v58_v11 = vld [vmem:[%s2262_s1 + $0xe0] sm:$0xff] }
  0x10   :  { %1336 = vmatprep.subr.bf16.mxu1 %v1335_v43  ;;  %v40_v6 = vld [vmem:[%s2262_s1 + $0x50] sm:$0xff]  ;;  %v41_v7 = vld [vmem:[%s2262_s1 + $0x58] sm:$0xff]  ;;  %v1343_v9 = vpack.c.bf16 %v89_v2, %v88_v1  ;;  %v59_v12 = vld [vmem:[%s2262_s1 + $0xe8] sm:$0xff] }
  0x11   :  { %v72_v8 = vld [vmem:[%s2262_s1 + $0x150] sm:$0xff]  ;;  %v73_v10 = vld [vmem:[%s2262_s1 + $0x158] sm:$0xff]  ;;  %v90_v14 = vld [vmem:[%s2262_s1 + $0x1e0] sm:$0xff]  ;;  %v1313_v16 = vpack.c.bf16 %v41_v7, %v40_v6  ;;  %v1315_v19 = vpack.c.bf16 %v59_v12, %v58_v11 }
  0x12   :  { %1306 = vmatpush3.bf16.msra.mxu0 %v1305_v53  ;;  %v91_v15 = vld [vmem:[%s2262_s1 + $0x1e8] sm:$0xff]  ;;  %v42_v17 = vld [vmem:[%s2262_s1 + $0x60] sm:$0xff]  ;;  %v1345_v18 = vpack.c.bf16 %v73_v10, %v72_v8  ;;  %v60_v25 = vld [vmem:[%s2262_s1 + $0xf0] sm:$0xff] }
  0x13   :  { %1338 = vmatpush3.bf16.msra.mxu1 %v1337_v54  ;;  %1308 = vmatprep.subr.bf16.mxu0 %v1307_v55  ;;  %v43_v20 = vld [vmem:[%s2262_s1 + $0x68] sm:$0xff]  ;;  %v74_v21 = vld [vmem:[%s2262_s1 + $0x160] sm:$0xff]  ;;  %v1347_v23 = vpack.c.bf16 %v91_v15, %v90_v14  ;;  %v61_v26 = vld [vmem:[%s2262_s1 + $0xf8] sm:$0xff] }
  0x14   :  { %1340 = vmatprep.subr.bf16.mxu1 %v1339_v59  ;;  %v26_v22 = vld [vmem:[%s2263_s0] sm:$0xff]  ;;  %v75_v24 = vld [vmem:[%s2262_s1 + $0x168] sm:$0xff]  ;;  %v92_v29 = vld [vmem:[%s2262_s1 + $0x1f0] sm:$0xff]  ;;  %v1317_v31 = vpack.c.bf16 %v43_v20, %v42_v17  ;;  %v1319_v35 = vpack.c.bf16 %v61_v26, %v60_v25 }
  0x15   :  { %v244_v27 = vrot.slane %v26_v22, %v1721_v13  ;;  %v237_v28 = vcombine.high %v26_v22, %v26_v22  ;;  %v93_v30 = vld [vmem:[%s2262_s1 + $0x1f8] sm:$0xff]  ;;  %v1349_v34 = vpack.c.bf16 %v75_v24, %v74_v21  ;;  %v44_v36 = vld [vmem:[%s2262_s1 + $0x70] sm:$0xff]  ;;  %v110_v42 = vld [vmem:[%s2262_s1 + $0x280] sm:$0xff] }
  0x16   :  { %1310 = vmatpush3.bf16.msra.mxu0 %v1309_v3  ;;  %v45_v37 = vld [vmem:[%s2262_s1 + $0x78] sm:$0xff]  ;;  %v76_v38 = vld [vmem:[%s2262_s1 + $0x170] sm:$0xff]  ;;  %v1351_v39 = vpack.c.bf16 %v93_v30, %v92_v29  ;;  %v111_v43 = vld [vmem:[%s2262_s1 + $0x288] sm:$0xff] }
  0x17   :  { %1342 = vmatpush3.bf16.msra.mxu1 %v1341_v4  ;;  %1312 = vmatprep.subr.bf16.mxu0 %v1311_v5  ;;  %v252_v32 = vcombine.high %v244_v27, %v244_v27  ;;  %v251_v33 = vrot.slane %v237_v28, %v1721_v13  ;;  %v77_v40 = vld [vmem:[%s2262_s1 + $0x178] sm:$0xff]  ;;  %v142_v44 = vld [vmem:[%s2262_s1 + $0x380] sm:$0xff]  ;;  %v143_v45 = vld [vmem:[%s2262_s1 + $0x388] sm:$0xff]  ;;  %v1321_v46 = vpack.c.bf16 %v45_v37, %v44_v36 }
  0x18   :  { %1344 = vmatprep.subr.bf16.mxu1 %v1343_v9  ;;  %v1353_v47 = vpack.c.bf16 %v77_v40, %v76_v38  ;;  %v1355_v48 = vpack.c.bf16 %v111_v43, %v110_v42  ;;  %v94_v50 = vld [vmem:[%s2262_s1 + $0x200] sm:$0xff]  ;;  %v95_v51 = vld [vmem:[%s2262_s1 + $0x208] sm:$0xff]  ;;  %v1387_v53 = vpack.c.bf16 %v143_v45, %v142_v44  ;;  %v112_v55 = vld [vmem:[%s2262_s1 + $0x290] sm:$0xff] }
  0x19   :  { %374 = vmatprep.mubr.f32.mxu0 %v252_v32  ;;  %v253_v41 = vcombine.high %v251_v33, %v251_v33  ;;  %v126_v52 = vld [vmem:[%s2262_s1 + $0x300] sm:$0xff]  ;;  %v127_v54 = vld [vmem:[%s2262_s1 + $0x308] sm:$0xff]  ;;  %v113_v56 = vld [vmem:[%s2262_s1 + $0x298] sm:$0xff]  ;;  %v1357_v59 = vpack.c.bf16 %v95_v51, %v94_v50 }
  0x1a   :  { %1314 = vmatpush3.bf16.msra.mxu0 %v1313_v16  ;;  %v144_v57 = vld [vmem:[%s2262_s1 + $0x390] sm:$0xff]  ;;  %v145_v58 = vld [vmem:[%s2262_s1 + $0x398] sm:$0xff]  ;;  %v1389_v60 = vpack.c.bf16 %v127_v54, %v126_v52  ;;  %v1359_v61 = vpack.c.bf16 %v113_v56, %v112_v55  ;;  %v114_v3 = vld [vmem:[%s2262_s1 + $0x2a0] sm:$0xff] }
  0x1b   :  { %1346 = vmatpush3.bf16.msra.mxu1 %v1345_v18  ;;  %1316 = vmatprep.subr.bf16.mxu0 %v1315_v19  ;;  %v96_v62 = vld [vmem:[%s2262_s1 + $0x210] sm:$0xff]  ;;  %v97_v63 = vld [vmem:[%s2262_s1 + $0x218] sm:$0xff]  ;;  %v1391_v1 = vpack.c.bf16 %v145_v58, %v144_v57  ;;  %v115_v4 = vld [vmem:[%s2262_s1 + $0x2a8] sm:$0xff] }
  0x1c   :  { %1348 = vmatprep.subr.bf16.mxu1 %v1347_v23  ;;  %444 = vmatprep.mubr.f32.mxu1 %v253_v41  ;;  %v128_v0 = vld [vmem:[%s2262_s1 + $0x310] sm:$0xff]  ;;  %v129_v2 = vld [vmem:[%s2262_s1 + $0x318] sm:$0xff]  ;;  %v146_v5 = vld [vmem:[%s2262_s1 + $0x3a0] sm:$0xff]  ;;  %v1361_v7 = vpack.c.bf16 %v97_v63, %v96_v62  ;;  %v1363_v9 = vpack.c.bf16 %v115_v4, %v114_v3 }
  0x1d   :  { %v147_v6 = vld [vmem:[%s2262_s1 + $0x3a8] sm:$0xff]  ;;  %v1393_v8 = vpack.c.bf16 %v129_v2, %v128_v0  ;;  %v98_v10 = vld [vmem:[%s2262_s1 + $0x220] sm:$0xff]  ;;  %v116_v16 = vld [vmem:[%s2262_s1 + $0x2b0] sm:$0xff] }
  0x1e   :  { %1318 = vmatpush3.bf16.msra.mxu0 %v1317_v31  ;;  %v99_v11 = vld [vmem:[%s2262_s1 + $0x228] sm:$0xff]  ;;  %v130_v12 = vld [vmem:[%s2262_s1 + $0x320] sm:$0xff]  ;;  %v1395_v14 = vpack.c.bf16 %v147_v6, %v146_v5  ;;  %v117_v17 = vld [vmem:[%s2262_s1 + $0x2b8] sm:$0xff] }
  0x1f   :  { %1350 = vmatpush3.bf16.msra.mxu1 %v1349_v34  ;;  %1320 = vmatprep.subr.bf16.mxu0 %v1319_v35  ;;  %v131_v15 = vld [vmem:[%s2262_s1 + $0x328] sm:$0xff]  ;;  %v148_v18 = vld [vmem:[%s2262_s1 + $0x3b0] sm:$0xff]  ;;  %v149_v19 = vld [vmem:[%s2262_s1 + $0x3b8] sm:$0xff]  ;;  %v1365_v20 = vpack.c.bf16 %v99_v11, %v98_v10  ;;  %v1367_v22 = vpack.c.bf16 %v117_v17, %v116_v16 }
  0x20   :  { %1352 = vmatprep.subr.bf16.mxu1 %v1351_v39  ;;  %v1397_v21 = vpack.c.bf16 %v131_v15, %v130_v12  ;;  %v100_v23 = vld [vmem:[%s2262_s1 + $0x230] sm:$0xff]  ;;  %v101_v24 = vld [vmem:[%s2262_s1 + $0x238] sm:$0xff]  ;;  %v1399_v26 = vpack.c.bf16 %v149_v19, %v148_v18  ;;  %v118_v28 = vld [vmem:[%s2262_s1 + $0x2c0] sm:$0xff] }
  0x21   :  { %v132_v25 = vld [vmem:[%s2262_s1 + $0x330] sm:$0xff]  ;;  %v119_v29 = vld [vmem:[%s2262_s1 + $0x2c8] sm:$0xff]  ;;  %v150_v30 = vld [vmem:[%s2262_s1 + $0x3c0] sm:$0xff] }
  0x22   :  { %1322 = vmatpush3.bf16.msra.mxu0 %v1321_v46  ;;  %v151_v31 = vld [vmem:[%s2262_s1 + $0x3c8] sm:$0xff]  ;;  %v1371_v37 = vpack.c.bf16 %v119_v29, %v118_v28  ;;  %v102_v38 = vld [vmem:[%s2262_s1 + $0x240] sm:$0xff]  ;;  %v120_v43 = vld [vmem:[%s2262_s1 + $0x2d0] sm:$0xff] }
  0x23   :  { %1354 = vmatpush3.bf16.msra.mxu1 %v1353_v47  ;;  %1356 = vmatprep.subr.bf16.mxu0 %v1355_v48  ;;  %v27_v32 = vld [vmem:[%s2263_s0 + $0x8] sm:$0xff]  ;;  %v134_v40 = vld [vmem:[%s2262_s1 + $0x340] sm:$0xff]  ;;  %v1403_v41 = vpack.c.bf16 %v151_v31, %v150_v30  ;;  %v121_v44 = vld [vmem:[%s2262_s1 + $0x2d8] sm:$0xff] }
  0x24   :  { %1388 = vmatprep.subr.bf16.mxu1 %v1387_v53  ;;  %v1882_v34 = vrot.slane %v27_v32, %v1721_v13  ;;  %v254_v35 = vcombine.high %v27_v32, %v27_v32  ;;  %v103_v39 = vld [vmem:[%s2262_s1 + $0x248] sm:$0xff]  ;;  %v152_v47 = vld [vmem:[%s2262_s1 + $0x3d0] sm:$0xff]  ;;  %v153_v48 = vld [vmem:[%s2262_s1 + $0x3d8] sm:$0xff]  ;;  %v1375_v53 = vpack.c.bf16 %v121_v44, %v120_v43 }
  0x25   :  { %375 = vmatmul.mubr.f32.vlgmr.msra.gmra.mrb[0].mxu0 %v244_v27  ;;  %v133_v27 = vld [vmem:[%s2262_s1 + $0x338] sm:$0xff]  ;;  %v135_v42 = vld [vmem:[%s2262_s1 + $0x348] sm:$0xff]  ;;  %v1373_v50 = vpack.c.bf16 %v103_v39, %v102_v38  ;;  %v104_v54 = vld [vmem:[%s2262_s1 + $0x250] sm:$0xff]  ;;  %v1407_v57 = vpack.c.bf16 %v153_v48, %v152_v47 }
  0x26   :  { %445 = vmatmul.mubr.f32.vlgmr.msra.gmra.mrb[0].mxu1 %v251_v33  ;;  %1358 = vmatpush3.bf16.msra.mxu0 %v1357_v59  ;;  %v1369_v33 = vpack.c.bf16 %v101_v24, %v100_v23  ;;  %v1401_v36 = vpack.c.bf16 %v133_v27, %v132_v25  ;;  %v269_v45 = vcombine.high %v1882_v34, %v1882_v34  ;;  %v105_v55 = vld [vmem:[%s2262_s1 + $0x258] sm:$0xff]  ;;  %v136_v56 = vld [vmem:[%s2262_s1 + $0x350] sm:$0xff]  ;;  %v122_v59 = vld [vmem:[%s2262_s1 + $0x2e0] sm:$0xff] }
  0x27   :  { %1390 = vmatpush3.bf16.msra.mxu1 %v1389_v60  ;;  %1360 = vmatprep.subr.bf16.mxu0 %v1359_v61  ;;  %v1905_v46 = vrot.slane %v254_v35, %v1721_v13  ;;  %v1405_v52 = vpack.c.bf16 %v135_v42, %v134_v40  ;;  %v137_v58 = vld [vmem:[%s2262_s1 + $0x358] sm:$0xff]  ;;  %v123_v60 = vld [vmem:[%s2262_s1 + $0x2e8] sm:$0xff]  ;;  %v154_v61 = vld [vmem:[%s2262_s1 + $0x3e0] sm:$0xff]  ;;  %v1377_v63 = vpack.c.bf16 %v105_v55, %v104_v54 }
  0x28   :  { %1392 = vmatprep.subr.bf16.mxu1 %v1391_v1  ;;  %514 = vmatprep.mubr.f32.mxu0 %v269_v45  ;;  %v155_v62 = vld [vmem:[%s2262_s1 + $0x3e8] sm:$0xff]  ;;  %v1409_v0 = vpack.c.bf16 %v137_v58, %v136_v56  ;;  %v1379_v1 = vpack.c.bf16 %v123_v60, %v122_v59  ;;  %v106_v2 = vld [vmem:[%s2262_s1 + $0x260] sm:$0xff]  ;;  %v157_v10 = vld [vmem:[%s2262_s1 + $0x3f8] sm:$0xff] }
  0x29   :  { %v270_v51 = vcombine.high %v1905_v46, %v1905_v46  ;;  %v107_v3 = vld [vmem:[%s2262_s1 + $0x268] sm:$0xff]  ;;  %v138_v4 = vld [vmem:[%s2262_s1 + $0x360] sm:$0xff]  ;;  %v1411_v5 = vpack.c.bf16 %v155_v62, %v154_v61  ;;  %v108_v15 = vld [vmem:[%s2262_s1 + $0x270] sm:$0xff] }
  0x2a   :  { %1362 = vmatpush3.bf16.msra.mxu0 %v1361_v7  ;;  %v139_v6 = vld [vmem:[%s2262_s1 + $0x368] sm:$0xff]  ;;  %v124_v7 = vld [vmem:[%s2262_s1 + $0x2f0] sm:$0xff]  ;;  %v1381_v11 = vpack.c.bf16 %v107_v3, %v106_v2  ;;  %v109_v16 = vld [vmem:[%s2262_s1 + $0x278] sm:$0xff] }
  0x2b   :  { %1394 = vmatpush3.bf16.msra.mxu1 %v1393_v8  ;;  %1364 = vmatprep.subr.bf16.mxu0 %v1363_v9  ;;  %v125_v8 = vld [vmem:[%s2262_s1 + $0x2f8] sm:$0xff]  ;;  %v156_v9 = vld [vmem:[%s2262_s1 + $0x3f0] sm:$0xff]  ;;  %v1413_v12 = vpack.c.bf16 %v139_v6, %v138_v4  ;;  %v207_v23 = vld [vmem:[%s2262_s1 + $0x588] sm:$0xff]  ;;  %v1385_v24 = vpack.c.bf16 %v109_v16, %v108_v15 }
  0x2c   :  { %1396 = vmatprep.subr.bf16.mxu1 %v1395_v14  ;;  %584 = vmatprep.mubr.f32.mxu1 %v270_v51  ;;  %v1383_v14 = vpack.c.bf16 %v125_v8, %v124_v7  ;;  %v140_v17 = vld [vmem:[%s2262_s1 + $0x370] sm:$0xff]  ;;  %v1415_v18 = vpack.c.bf16 %v157_v10, %v156_v9  ;;  %v141_v19 = vld [vmem:[%s2262_s1 + $0x378] sm:$0xff]  ;;  %v158_v25 = vld [vmem:[%s2262_s1 + $0x400] sm:$0xff] }
  0x2d   :  { %v159_v28 = vld [vmem:[%s2262_s1 + $0x408] sm:$0xff]  ;;  %v190_v29 = vld [vmem:[%s2262_s1 + $0x500] sm:$0xff]  ;;  %v176_v32 = vld [vmem:[%s2262_s1 + $0x490] sm:$0xff] }
  0x2e   :  { %1366 = vmatpush3.bf16.msra.mxu0 %v1365_v20  ;;  %v174_v20 = vld [vmem:[%s2262_s1 + $0x480] sm:$0xff]  ;;  %v191_v30 = vld [vmem:[%s2262_s1 + $0x508] sm:$0xff]  ;;  %v208_v35 = vld [vmem:[%s2262_s1 + $0x590] sm:$0xff] }
  0x2f   :  { %1398 = vmatpush3.bf16.msra.mxu1 %v1397_v21  ;;  %1368 = vmatprep.subr.bf16.mxu0 %v1367_v22  ;;  %v175_v21 = vld [vmem:[%s2262_s1 + $0x488] sm:$0xff]  ;;  %v206_v22 = vld [vmem:[%s2262_s1 + $0x580] sm:$0xff]  ;;  %v1453_v38 = vpack.c.bf16 %v191_v30, %v190_v29  ;;  %v28_v39 = vld [vmem:[%s2263_s0 + $0x10] sm:$0xff] }
  0x30   :  { %1400 = vmatprep.subr.bf16.mxu1 %v1399_v26  ;;  %v1417_v26 = vpack.c.bf16 %v141_v19, %v140_v17  ;;  %v1419_v27 = vpack.c.bf16 %v175_v21, %v174_v20  ;;  %v1451_v31 = vpack.c.bf16 %v207_v23, %v206_v22  ;;  %v161_v42 = vld [vmem:[%s2262_s1 + $0x418] sm:$0xff]  ;;  %v192_v43 = vld [vmem:[%s2262_s1 + $0x510] sm:$0xff]  ;;  %v2024_v44 = vrot.slane %v28_v39, %v1721_v13  ;;  %v179_v51 = vld [vmem:[%s2262_s1 + $0x4a8] sm:$0xff] }
  0x31   :  { %v271_v45 = vcombine.high %v28_v39, %v28_v39  ;;  %v193_v48 = vld [vmem:[%s2262_s1 + $0x518] sm:$0xff]  ;;  %v162_v58 = vld [vmem:[%s2262_s1 + $0x420] sm:$0xff]  ;;  %v163_v59 = vld [vmem:[%s2262_s1 + $0x428] sm:$0xff] }
  0x32   :  { %1370 = vmatpush3.bf16.msra.mxu0 %v1369_v33  ;;  %v177_v33 = vld [vmem:[%s2262_s1 + $0x498] sm:$0xff]  ;;  %v286_v54 = vcombine.high %v2024_v44, %v2024_v44  ;;  %v195_v61 = vld [vmem:[%s2262_s1 + $0x528] sm:$0xff]  ;;  %v180_v62 = vld [vmem:[%s2262_s1 + $0x4b0] sm:$0xff]  ;;  %v1429_v2 = vpack.c.bf16 %v163_v59, %v162_v58 }
  0x33   :  { %1402 = vmatpush3.bf16.msra.mxu1 %v1401_v36  ;;  %1372 = vmatprep.subr.bf16.mxu0 %v1371_v37  ;;  %v209_v36 = vld [vmem:[%s2262_s1 + $0x598] sm:$0xff]  ;;  %v1421_v37 = vpack.c.bf16 %v159_v28, %v158_v25  ;;  %v1423_v40 = vpack.c.bf16 %v177_v33, %v176_v32  ;;  %v2045_v55 = vrot.slane %v271_v45, %v1721_v13  ;;  %v194_v13 = vld [vmem:[%s2262_s1 + $0x520] sm:$0xff]  ;;  %v196_v7 = vld [vmem:[%s2262_s1 + $0x530] sm:$0xff] }
  0x34   :  { %1404 = vmatprep.subr.bf16.mxu1 %v1403_v41  ;;  %v160_v41 = vld [vmem:[%s2262_s1 + $0x410] sm:$0xff]  ;;  %v1455_v47 = vpack.c.bf16 %v209_v36, %v208_v35  ;;  %v1461_v3 = vpack.c.bf16 %v195_v61, %v194_v13  ;;  %v165_v6 = vld [vmem:[%s2262_s1 + $0x438] sm:$0xff]  ;;  %v182_v10 = vld [vmem:[%s2262_s1 + $0x4c0] sm:$0xff] }
  0x35   :  { %v1425_v56 = vpack.c.bf16 %v161_v42, %v160_v41  ;;  %v197_v9 = vld [vmem:[%s2262_s1 + $0x538] sm:$0xff]  ;;  %v167_v19 = vld [vmem:[%s2262_s1 + $0x448] sm:$0xff]  ;;  %v198_v20 = vld [vmem:[%s2262_s1 + $0x540] sm:$0xff] }
  0x36   :  { %1374 = vmatpush3.bf16.msra.mxu0 %v1373_v50  ;;  %v178_v50 = vld [vmem:[%s2262_s1 + $0x4a0] sm:$0xff]  ;;  %v1465_v16 = vpack.c.bf16 %v197_v9, %v196_v7  ;;  %v199_v22 = vld [vmem:[%s2262_s1 + $0x548] sm:$0xff]  ;;  %v184_v23 = vld [vmem:[%s2262_s1 + $0x4d0] sm:$0xff] }
  0x37   :  { %1406 = vmatpush3.bf16.msra.mxu1 %v1405_v52  ;;  %1376 = vmatprep.subr.bf16.mxu0 %v1375_v53  ;;  %v210_v52 = vld [vmem:[%s2262_s1 + $0x5a0] sm:$0xff]  ;;  %v211_v53 = vld [vmem:[%s2262_s1 + $0x5a8] sm:$0xff]  ;;  %v216_v25 = vld [vmem:[%s2262_s1 + $0x5d0] sm:$0xff]  ;;  %v1469_v28 = vpack.c.bf16 %v199_v22, %v198_v20 }
  0x38   :  { %1408 = vmatprep.subr.bf16.mxu1 %v1407_v57  ;;  %v1427_v57 = vpack.c.bf16 %v179_v51, %v178_v50  ;;  %v1459_v60 = vpack.c.bf16 %v211_v53, %v210_v52  ;;  %v168_v30 = vld [vmem:[%s2262_s1 + $0x450] sm:$0xff]  ;;  %v201_v35 = vld [vmem:[%s2262_s1 + $0x558] sm:$0xff]  ;;  %v186_v36 = vld [vmem:[%s2262_s1 + $0x4e0] sm:$0xff] }
  0x39   :  { %v200_v32 = vld [vmem:[%s2262_s1 + $0x550] sm:$0xff]  ;;  %v219_v39 = vld [vmem:[%s2262_s1 + $0x5e8] sm:$0xff]  ;;  %v189_v52 = vld [vmem:[%s2262_s1 + $0x4f8] sm:$0xff] }
  0x3a   :  { %1378 = vmatpush3.bf16.msra.mxu0 %v1377_v63  ;;  %v181_v63 = vld [vmem:[%s2262_s1 + $0x4b8] sm:$0xff]  ;;  %v1473_v41 = vpack.c.bf16 %v201_v35, %v200_v32  ;;  %v171_v45 = vld [vmem:[%s2262_s1 + $0x468] sm:$0xff]  ;;  %v188_v51 = vld [vmem:[%s2262_s1 + $0x4f0] sm:$0xff] }
  0x3b   :  { %1410 = vmatpush3.bf16.msra.mxu1 %v1409_v0  ;;  %1380 = vmatprep.subr.bf16.mxu0 %v1379_v1  ;;  %v212_v0 = vld [vmem:[%s2262_s1 + $0x5b0] sm:$0xff]  ;;  %v213_v1 = vld [vmem:[%s2262_s1 + $0x5b8] sm:$0xff]  ;;  %v1431_v4 = vpack.c.bf16 %v181_v63, %v180_v62  ;;  %v203_v50 = vld [vmem:[%s2262_s1 + $0x568] sm:$0xff] }
  0x3c   :  { %1412 = vmatprep.subr.bf16.mxu1 %v1411_v5  ;;  %v164_v5 = vld [vmem:[%s2262_s1 + $0x430] sm:$0xff]  ;;  %v1463_v8 = vpack.c.bf16 %v213_v1, %v212_v0  ;;  %v173_v59 = vld [vmem:[%s2262_s1 + $0x478] sm:$0xff]  ;;  %v222_v63 = vld [vmem:[%s2262_s1 + $0x600] sm:$0xff] }
  0x3d   :  { %v1433_v15 = vpack.c.bf16 %v165_v6, %v164_v5  ;;  %v220_v53 = vld [vmem:[%s2262_s1 + $0x5f0] sm:$0xff]  ;;  %v223_v0 = vld [vmem:[%s2262_s1 + $0x608] sm:$0xff]  ;;  %v1528_v5 = vmov 0.0  }
  0x3e   :  { %1382 = vmatpush3.bf16.msra.mxu0 %v1381_v11  ;;  %v183_v11 = vld [vmem:[%s2262_s1 + $0x4c8] sm:$0xff]  ;;  %v172_v58 = vld [vmem:[%s2262_s1 + $0x470] sm:$0xff]  ;;  %v1484_v1 = vpack.c.bf16 %v223_v0, %v222_v63  ;;  %v1013_v7 = vld.sshfl [vmem:[%s2263_s0 + $0x18] sm:$0x3 pattern:$0x76325410] }
  0x3f   :  { %1414 = vmatpush3.bf16.msra.mxu1 %v1413_v12  ;;  %1384 = vmatprep.subr.bf16.mxu0 %v1383_v14  ;;  %v214_v12 = vld [vmem:[%s2262_s1 + $0x5c0] sm:$0xff]  ;;  %v215_v14 = vld [vmem:[%s2262_s1 + $0x5c8] sm:$0xff]  ;;  %v1435_v17 = vpack.c.bf16 %v183_v11, %v182_v10  ;;  %v1449_v61 = vpack.c.bf16 %v173_v59, %v172_v58  ;;  %v803_v9 = vld [vmem:[%s2264_s3 + $0x10] sm:$0xff] }
  0x40   :  { %1416 = vmatprep.subr.bf16.mxu1 %v1415_v18  ;;  %v166_v18 = vld [vmem:[%s2262_s1 + $0x440] sm:$0xff]  ;;  %v1467_v21 = vpack.c.bf16 %v215_v14, %v214_v12  ;;  %v804_v10 = vld [vmem:[%s2264_s3 + $0x18] sm:$0xff] }
  0x41   :  { %v1493_v11 = vpack.c.bf16 %v804_v10, %v803_v9  ;;  %v1015_v58 = vld [vmem:[%s2267_s4] ss:$0 sm:$0xff] }
  0x42   :  { %1386 = vmatpush3.bf16.msra.mxu0 %v1385_v24  ;;  %v185_v24 = vld [vmem:[%s2262_s1 + $0x4d8] sm:$0xff] }
  0x43   :  { %1418 = vmatpush3.bf16.msra.mxu1 %v1417_v26  ;;  %1420 = vmatprep.subr.bf16.mxu0 %v1419_v27  ;;  %v217_v26 = vld [vmem:[%s2262_s1 + $0x5d8] sm:$0xff]  ;;  %v1437_v27 = vpack.c.bf16 %v167_v19, %v166_v18  ;;  %v1439_v29 = vpack.c.bf16 %v185_v24, %v184_v23 }
  0x44   :  { %1452 = vmatprep.subr.bf16.mxu1 %v1451_v31  ;;  %v169_v31 = vld [vmem:[%s2262_s1 + $0x458] sm:$0xff]  ;;  %v1471_v33 = vpack.c.bf16 %v217_v26, %v216_v25 }
  0x45   :  { %515 = vmatmul.mubr.f32.vlgmr.msra.gmra.mrb[2].mxu0 %v1882_v34  ;;  %v1457_v34 = vpack.c.bf16 %v193_v48, %v192_v43  ;;  %v170_v43 = vld [vmem:[%s2262_s1 + $0x460] sm:$0xff] }
  0x46   :  { %585 = vmatmul.mubr.f32.vlgmr.msra.gmra.mrb[2].mxu1 %v1905_v46  ;;  %1422 = vmatpush3.bf16.msra.mxu0 %v1421_v37  ;;  %v287_v46 = vcombine.high %v2045_v55, %v2045_v55  ;;  %v187_v37 = vld [vmem:[%s2262_s1 + $0x4e8] sm:$0xff] }
  0x47   :  { %1454 = vmatpush3.bf16.msra.mxu1 %v1453_v38  ;;  %1424 = vmatprep.subr.bf16.mxu0 %v1423_v40  ;;  %v218_v38 = vld [vmem:[%s2262_s1 + $0x5e0] sm:$0xff]  ;;  %v1441_v40 = vpack.c.bf16 %v169_v31, %v168_v30  ;;  %v1443_v42 = vpack.c.bf16 %v187_v37, %v186_v36 }
  0x48   :  { %1456 = vmatprep.subr.bf16.mxu1 %v1455_v47  ;;  %654 = vmatprep.mubr.f32.mxu0 %v286_v54  ;;  %v202_v47 = vld [vmem:[%s2262_s1 + $0x560] sm:$0xff]  ;;  %v1475_v48 = vpack.c.bf16 %v219_v39, %v218_v38  ;;  %v221_v54 = vld [vmem:[%s2262_s1 + $0x5f8] sm:$0xff] }
  0x49   :  { %724 = vmatprep.mubr.f32.mxu1 %v287_v46  ;;  %v1479_v13 = vpack.c.bf16 %v221_v54, %v220_v53  ;;  %v204_v46 = vld [vmem:[%s2262_s1 + $0x570] sm:$0xff]  ;;  %v897_v53 = vld [vmem:[%s2266_s5 + $0x28] sm:$0xff] }
  0x4a   :  { %1426 = vmatpush3.bf16.msra.mxu0 %v1425_v56  ;;  %v1445_v56 = vpack.c.bf16 %v171_v45, %v170_v43  ;;  %v892_v43 = vld [vmem:[%s2266_s5] sm:$0xff]  ;;  %v893_v45 = vld [vmem:[%s2266_s5 + $0x8] sm:$0xff] }
  0x4b   :  { %1458 = vmatpush3.bf16.msra.mxu1 %v1457_v34  ;;  %1428 = vmatprep.subr.bf16.mxu0 %v1427_v57  ;;  %v1477_v34 = vpack.c.bf16 %v203_v50, %v202_v47  ;;  %v1447_v57 = vpack.c.bf16 %v189_v52, %v188_v51  ;;  %v1496_v47 = vpack.c.bf16 %v893_v45, %v892_v43  ;;  %v895_v50 = vld [vmem:[%s2266_s5 + $0x18] sm:$0xff]  ;;  %v896_v52 = vld [vmem:[%s2266_s5 + $0x20] sm:$0xff] }
  0x4c   :  { %1460 = vmatprep.subr.bf16.mxu1 %v1459_v60  ;;  %v205_v60 = vld [vmem:[%s2262_s1 + $0x578] sm:$0xff]  ;;  %v1502_v54 = vpack.c.bf16 %v897_v53, %v896_v52 }
  0x4d   :  { %v1481_v62 = vpack.c.bf16 %v205_v60, %v204_v46 }
  0x4e   :  { %1430 = vmatpush3.bf16.msra.mxu0 %v1429_v2  ;;  %v1526_v2 = vmov 0.0|0.0  }
  0x4f   :  { %1462 = vmatpush3.bf16.msra.mxu1 %v1461_v3  ;;  %1432 = vmatprep.subr.bf16.mxu0 %v1431_v4  ;;  %v224_v3 = vld [vmem:[%s2262_s1 + $0x610] sm:$0xff]  ;;  %v225_v4 = vld [vmem:[%s2262_s1 + $0x618] sm:$0xff] }
  0x50   :  { %1464 = vmatprep.subr.bf16.mxu1 %v1463_v8  ;;  %v1487_v6 = vpack.c.bf16 %v225_v4, %v224_v3  ;;  %v1018_v3 = vld [vmem:[%s2268_s6] ss:$0 sm:$0xff] }
  0x52   :  { %1434 = vmatpush3.bf16.msra.mxu0 %v1433_v15  ;;  %v1012_v15 = vld [vmem:[%s2265_s2] ss:$0 sm:$0xff] }
  0x53   :  { %1466 = vmatpush3.bf16.msra.mxu1 %v1465_v16  ;;  %1436 = vmatprep.subr.bf16.mxu0 %v1435_v17 }
  0x54   :  { %1468 = vmatprep.subr.bf16.mxu1 %v1467_v21 }
  0x56   :  { %1438 = vmatpush3.bf16.msra.mxu0 %v1437_v27 }
  0x57   :  { %1470 = vmatpush3.bf16.msra.mxu1 %v1469_v28  ;;  %1440 = vmatprep.subr.bf16.mxu0 %v1439_v29 }
  0x58   :  { %1472 = vmatprep.subr.bf16.mxu1 %v1471_v33 }
  0x5a   :  { %1442 = vmatpush3.bf16.msra.mxu0 %v1441_v40 }
  0x5b   :  { %1474 = vmatpush3.bf16.msra.mxu1 %v1473_v41  ;;  %1444 = vmatprep.subr.bf16.mxu0 %v1443_v42 }
  0x5c   :  { %1476 = vmatprep.subr.bf16.mxu1 %v1475_v48  ;;  %v894_v48 = vld [vmem:[%s2266_s5 + $0x10] sm:$0xff] }
  0x5d   :  { %v1499_v51 = vpack.c.bf16 %v895_v50, %v894_v48 }
  0x5e   :  { %1446 = vmatpush3.bf16.msra.mxu0 %v1445_v56  ;;  %v898_v56 = vld [vmem:[%s2266_s5 + $0x30] sm:$0xff] }
  0x5f   :  { %1478 = vmatpush3.bf16.msra.mxu1 %v1477_v34  ;;  %1448 = vmatprep.subr.bf16.mxu0 %v1447_v57  ;;  %v899_v34 = vld [vmem:[%s2266_s5 + $0x38] sm:$0xff] }
  0x60   :  { %1480 = vmatprep.subr.bf16.mxu1 %v1479_v13  ;;  %v1505_v57 = vpack.c.bf16 %v899_v34, %v898_v56 }
  0x62   :  { %1450 = vmatpush3.bf16.msra.mxu0 %v1449_v61 }
  0x63   :  { %1482 = vmatpush3.bf16.msra.mxu1 %v1481_v62  ;;  %1495 = vmatprep.subr.bf16.mxu0 %v1526_v2 }
  0x64   :  { %1483 = vmatprep.subr.bf16.mxu1 %v1526_v2 }
  0x65   :  { %655 = vmatmul.mubr.f32.vlgmr.msra.gmra.mrb[4].mxu0 %v2024_v44  ;;  %v801_v44 = vld [vmem:[%s2264_s3] sm:$0xff] }
  0x66   :  { %725 = vmatmul.mubr.f32.vlgmr.msra.gmra.mrb[4].mxu1 %v2045_v55  ;;  %1288 = vmatprep.mubr.msk.f32.mxu0 %vm1527_vm0, %v1528_v5  ;;  %v802_v55 = vld [vmem:[%s2264_s3 + $0x8] sm:$0xff] }
  0x67   :  { %1485 = vmatpush3.bf16.msra.mxu1 %v1484_v1  ;;  %1258 = vmatprep.mubr.msk.f32.mxu1 %vm1527_vm0, %v1528_v5  ;;  %v1490_v8 = vpack.c.bf16 %v802_v55, %v801_v44  ;;  %v1529_v1 = vmov 6  }
  0x68   :  { %1486 = vmatprep.subr.bf16.mxu1 %v1526_v2  ;;  %1497 = vmatpush3.bf16.msra.mxu0 %v1496_v47 }
  0x69   :  { %1498 = vmatprep.subr.bf16.mxu0 %v1526_v2  ;;  %1512 = vset.pattern.permute.xlu1 %v1529_v1 }
  0x6a   :  { %1513 = vset.pattern.permute.xlu0 %v1529_v1 }
  0x6b   :  { %1488 = vmatpush3.bf16.msra.mxu1 %v1487_v6 }
  0x6c   :  { %1489 = vmatprep.subr.bf16.mxu1 %v1526_v2  ;;  %1500 = vmatpush3.bf16.msra.mxu0 %v1499_v51 }
  0x6d   :  { %1501 = vmatprep.subr.bf16.mxu0 %v1526_v2 }
  0x6e   :  { %1259 = vmatmul.mubr.msk.f32.vlgmr.msra.gmra.mrb[6].mxu1 %vm307_vm1, %v1013_v7 }
  0x6f   :  { %1269 = vmatprep.mubr.msk.f32.mxu1 %vm1527_vm0, %v1528_v5  ;;  %1491 = vmatpush3.bf16.msra.mxu1 %v1490_v8 }
  0x70   :  { %1492 = vmatprep.subr.bf16.mxu1 %v1526_v2  ;;  %1503 = vmatpush3.bf16.msra.mxu0 %v1502_v54 }
  0x71   :  { %1504 = vmatprep.subr.bf16.mxu0 %v1526_v2  ;;  %v982_v2 = vand.u32 127, %v241_v49 }
  0x73   :  { %1494 = vmatpush3.bf16.msra.mxu1 %v1493_v11  ;;  %vm983_vm3 = vcmp.lt.s32.totalorder %v982_v2, 6  ;;  %vm997_vm5 = vcmp.eq.s32.totalorder %v982_v2, 6 }
  0x74   :  { %1506 = vmatpush3.bf16.msra.mxu0 %v1505_v57 }
  0xf8   :  { %v1053_v12 = vpop.f32.mrb[0].mxu0 }
  0xf9   :  { %v1088_v14 = vpop.f32.mrb[0].mxu1  ;;  %v1054_v16 = vpop.f32.mrb[1].mxu0 }
  0xfa   :  { %v1055_v17 = vadd.f32 %v1054_v16, %v1053_v12  ;;  %v1089_v18 = vpop.f32.mrb[1].mxu1 }
  0xfb   :  { %v1090_v19 = vadd.f32 %v1089_v18, %v1088_v14  ;;  %v1020_v14 = vsel %vm997_vm5, 1.0, %v1528_v5 }
  0xfc   :  { %v377_v20 = vadd.f32 %v1055_v17, %v1012_v15 }
  0xfe   :  { %v447_v21 = vadd.f32 %v1090_v19, %v377_v20 }
 0x118   :  { %v1123_v22 = vpop.f32.mrb[2].mxu0 }
 0x119   :  { %v1158_v23 = vpop.f32.mrb[2].mxu1  ;;  %v1124_v24 = vpop.f32.mrb[3].mxu0 }
 0x11a   :  { %v1125_v25 = vadd.f32 %v1124_v24, %v1123_v22  ;;  %v1159_v26 = vpop.f32.mrb[3].mxu1 }
 0x11b   :  { %v1160_v27 = vadd.f32 %v1159_v26, %v1158_v23 }
 0x11c   :  { %v517_v28 = vadd.f32 %v1125_v25, %v447_v21 }
 0x11e   :  { %v587_v29 = vadd.f32 %v1160_v27, %v517_v28 }
 0x138   :  { %v1193_v30 = vpop.f32.mrb[4].mxu0 }
 0x139   :  { %v1228_v31 = vpop.f32.mrb[4].mxu1  ;;  %v1194_v32 = vpop.f32.mrb[5].mxu0 }
 0x13a   :  { %v1195_v33 = vadd.f32 %v1194_v32, %v1193_v30  ;;  %v1229_v35 = vpop.f32.mrb[5].mxu1 }
 0x13b   :  { %v1230_v36 = vadd.f32 %v1229_v35, %v1228_v31 }
 0x13c   :  { %v657_v37 = vadd.f32 %v1195_v33, %v587_v29 }
 0x13e   :  { %v727_v38 = vadd.f32 %v1230_v36, %v657_v37 }
 0x141   :  { %v796_v39 = vpop.f32.mrb[6].mxu1 }
 0x142   :  { %v797_v40 = vadd.f32 %v796_v39, %v727_v38  ;;  %v1260_v41 = vpop.f32.mrb[7].mxu1 }
 0x144   :  { %v800_v42 = vmax.f32 %v797_v40, 0.0 }
 0x146   :  { %1270 = vmatmul.mubr.msk.f32.vlgmr.msra.gmra.mrb[8].mxu1 %vm307_vm1, %v800_v42 }
 0x219   :  { %v881_v59 = vpop.f32.mrb[8].mxu1 }
 0x21a   :  { %v882_v13 = vadd.f32 %v1015_v58, %v881_v59  ;;  %v1271_v46 = vpop.f32.mrb[9].mxu1 }
 0x21c   :  { %v1017_v60 = vmul.f32 -1.442695, %v882_v13 }
 0x21e   :  { %1517 = vpow2.f32 %v1017_v60 }
 0x228   :  { %v1518_v61 = vpop.eup %1517 }
 0x229   :  { %v888_v62 = vadd.f32 1.0, %v1518_v61 }
 0x22b   :  { %1519 = vrcp.f32 %v888_v62 }
 0x235   :  { %v1520_v63 = vpop.eup %1519 }
 0x236   :  { %v891_v0 = vmul.f32 %v1520_v63, %v882_v13 }
 0x238   :  { %1289 = vmatmul.mubr.msk.f32.vlgmr.msra.gmra.mrb[6].mxu0 %vm907_vm2, %v891_v0 }
 0x30b   :  { %v977_v4 = vpop.f32.mrb[6].mxu0 }
 0x30c   :  { %v978_v6 = vadd.f32 %v1018_v3, %v977_v4  ;;  %v1290_v7 = vpop.f32.mrb[7].mxu0 }
 0x30e   :  { %1002 = vperm.xlu1 %1512, %v978_v6   ;;  %v984_v44 = vsel %vm983_vm3, %v978_v6, -1e+30 }
 0x30f   :  { %v986_v55 = vsel %vm985_vm4, %v984_v44, -inf }
 0x310   :  { %987 = vmax.xlane.f32.xlu0 %v986_v55 }
 0x38d   :  { %v1003_v15 = vpop.permute.xlu1 %1002 }
 0x38e   :  { %v1005_v17 = vmul.f32 %v1020_v14, %v1003_v15 }
 0x39d   :  { %v988_v8 = vpop.xlane.xlu0 %987 }
 0x39e   :  { %v989_v9 = vsub.f32 %v984_v44, %v988_v8 }
 0x3a0   :  { %v990_v10 = vmul.f32 1.442695, %v989_v9 }
 0x3a2   :  { %1521 = vpow2.f32 %v990_v10 }
 0x3ac   :  { %v1522_v11 = vpop.eup %1521 }
 0x3ad   :  { %v992_v12 = vsel %vm985_vm4, %v1522_v11, 0.0 }
 0x3ae   :  { %993 = vadd.xlane.f32.xlu0 %v992_v12 }
 0x43b   :  { %v994_v49 = vpop.xlane.xlu0 %993 }
 0x43c   :  { %1523 = vrcp.f32 %v994_v49 }
 0x446   :  { %v1524_v16 = vpop.eup %1523 }
 0x447   :  { %v996_v18 = vmul.f32 %v1524_v16, %v1522_v11 }
 0x449   :  { %v1006_v19 = vadd.f32 %v1005_v17, %v996_v18 }
 0x44b   :  { %1007 = vst [vmem:[%s2269_s7] sm:$0x3] %v1006_v19 }

</bundles_post_ra>
